<compile_context>
chip_gen: v6e
topology: v6e:2x2x1
jax: 0.10.0
libtpu: 0.0.40
codegen_flags: <defaults>
</compile_context>

<pallas_src>
import jax
import jax.numpy as jnp
from jax import lax
from jax.experimental import pallas as pl
from jax.experimental.pallas import tpu as pltpu


def cbow_kernel(idx_ref, fused_ref, out_ref):
    TB, C = idx_ref.shape
    V = fused_ref.shape[1]

    idx = idx_ref[...]                                         # (TB, C) int32 (~16 vregs)
    vocab = lax.broadcasted_iota(jnp.int32, (TB, V), 1)        # lane iota, reused for all c

    # Per-context accumulation (static unroll over small C); keeps vreg
    # pressure low and avoids materializing a (TB, C, V) intermediate.
    counts = jnp.zeros((TB, V), jnp.float32)
    for c in range(C):
        counts = counts + (idx[:, c:c + 1] == vocab).astype(jnp.float32)

    # logits = counts @ fused, where fused = (emb @ W.T) / C (f32, VMEM-resident).
    logits = jnp.dot(counts, fused_ref[...],
                     preferred_element_type=jnp.float32)       # (TB, V) f32

    # log_softmax along the vocab axis (f32 throughout).
    m = jnp.max(logits, axis=1, keepdims=True)
    z = logits - m
    lse = jnp.log(jnp.sum(jnp.exp(z), axis=1, keepdims=True))
    out_ref[...] = z - lse


def make_fused_weights(emb, w, context_size):
    """Precompute (emb @ W.T) / C once; log_softmax is shift/scale-aware so the
    1/C mean folds into the fused matrix. Hoisted out of the per-call forward."""
    fused = jnp.dot(emb.astype(jnp.float32), w.astype(jnp.float32).T,
                    preferred_element_type=jnp.float32)
    return (fused * (1.0 / context_size)).astype(jnp.float32)  # (V, V) f32


def _choose_tb(B, tb_max):
    """Largest divisor of B that is a multiple of 8 and <= tb_max (sublane-legal
    tile, keeps the grid non-degenerate/even when possible); fallback tb = B."""
    tb_max = min(tb_max, B)
    for cand in range(tb_max, 0, -1):
        if B % cand == 0 and cand % 8 == 0:
            return cand
    return B


def cbow_forward(idx, fused, *, tb=128):
    B, C = idx.shape
    V = fused.shape[1]

    tb = _choose_tb(B, tb)
    grid = (B // tb,)

    return pl.pallas_call(
        cbow_kernel,
        out_shape=jax.ShapeDtypeStruct((B, V), jnp.float32),
        grid=grid,
        in_specs=[
            # Pipelined batch tile of raw (B, C) indices.
            pl.BlockSpec((tb, C), lambda i: (i, 0)),
            # Whole fused weight resident in VMEM once (no per-step buffering).
            pl.BlockSpec(memory_space=pltpu.MemorySpace.VMEM),
        ],
        out_specs=pl.BlockSpec((tb, V), lambda i: (i, 0)),     # lane-dense (V=128)
        compiler_params=pltpu.CompilerParams(
            dimension_semantics=("parallel",)),                # v7x megacore sharding
    )(idx.astype(jnp.int32), fused)


if __name__ == "__main__":
    # Small shapes consistent with the module: vocab=128, embedding_dim=32,
    # context window=8, batch 256 -> tb=128 gives an even grid=(2,).
    V, E, B, C = 128, 32, 256, 8

    key = jax.random.PRNGKey(0)
    k_emb, k_w, k_idx = jax.random.split(key, 3)

    # nn.Embedding init ~ N(0,1); padding_idx=0 => row 0 zeroed.
    emb = jax.random.normal(k_emb, (V, E), dtype=jnp.float32)
    emb = emb.at[0].set(0.0)
    # nn.Linear(E, V, bias=False): weight (V, E) ~ U(-1/sqrt(E), 1/sqrt(E)).
    bound = 1.0 / (E ** 0.5)
    w = jax.random.uniform(k_w, (V, E), dtype=jnp.float32, minval=-bound, maxval=bound)

    idx = jax.random.randint(k_idx, (B, C), 0, V, dtype=jnp.int32)

    # Precompute the fused weight once (would be cached across steps in training).
    fused = make_fused_weights(emb, w, C)

    out = cbow_forward(idx, fused)
    jax.block_until_ready(out)

    # Pure-JAX f32 reference (matches the PyTorch module semantics).
    ref_means = jnp.mean(emb[idx], axis=1)
    ref_logits = ref_means @ w.T
    ref = jax.nn.log_softmax(ref_logits, axis=1)
    # All-f32 path now -> tight tolerance.
    assert jnp.allclose(out, ref, atol=1e-4, rtol=1e-4), "mismatch vs reference"

    print("KERNEL_OK")
</pallas_src>

<mosaic_0001>
module attributes {stable_mosaic.version = 11 : i64} {
  func.func @cbow_kernel(%arg0: i32, %arg1: memref<128x8xi32, #tpu.memory_space<vmem>>, %arg2: memref<128x128xf32, #tpu.memory_space<vmem>>, %arg3: memref<128x128xf32, #tpu.memory_space<vmem>>) attributes {dimension_semantics = [#tpu.dimension_semantics<parallel>], iteration_bounds = array<i64: 2>, scalar_prefetch = 0 : i64, scratch_operands = 0 : i64, tpu.core_type = #tpu.core_type<tc>, window_params = [{transform_indices = @transform_0, window_bounds = array<i64: 128, 8>}, {pipeline_mode = #tpu.pipeline_mode<synchronous>, transform_indices = @transform_1, window_bounds = array<i64: 128, 128>}, {transform_indices = @transform_2, window_bounds = array<i64: 128, 128>}]} {
    %c0 = arith.constant 0 : index
    %c0_0 = arith.constant 0 : index
    %0 = vector.load %arg1[%c0, %c0_0] : memref<128x8xi32, #tpu.memory_space<vmem>>, vector<128x8xi32>
    %1 = tpu.iota {dimensions = array<i32: 1>} : vector<128x128xi32>
    %cst = arith.constant 0.000000e+00 : f32
    %2 = vector.broadcast %cst : f32 to vector<128x128xf32>
    %3 = vector.extract_strided_slice %0 {offsets = [0, 0], sizes = [128, 1], strides = [1, 1]} : vector<128x8xi32> to vector<128x1xi32>
    %4 = vector.broadcast %3 : vector<128x1xi32> to vector<128x128xi32>
    %5 = arith.cmpi eq, %4, %1 : vector<128x128xi32>
    %6 = arith.extui %5 : vector<128x128xi1> to vector<128x128xi32>
    %7 = arith.sitofp %6 : vector<128x128xi32> to vector<128x128xf32>
    %8 = arith.addf %2, %7 : vector<128x128xf32>
    %9 = vector.extract_strided_slice %0 {offsets = [0, 1], sizes = [128, 1], strides = [1, 1]} : vector<128x8xi32> to vector<128x1xi32>
    %10 = vector.broadcast %9 : vector<128x1xi32> to vector<128x128xi32>
    %11 = arith.cmpi eq, %10, %1 : vector<128x128xi32>
    %12 = arith.extui %11 : vector<128x128xi1> to vector<128x128xi32>
    %13 = arith.sitofp %12 : vector<128x128xi32> to vector<128x128xf32>
    %14 = arith.addf %8, %13 : vector<128x128xf32>
    %15 = vector.extract_strided_slice %0 {offsets = [0, 2], sizes = [128, 1], strides = [1, 1]} : vector<128x8xi32> to vector<128x1xi32>
    %16 = vector.broadcast %15 : vector<128x1xi32> to vector<128x128xi32>
    %17 = arith.cmpi eq, %16, %1 : vector<128x128xi32>
    %18 = arith.extui %17 : vector<128x128xi1> to vector<128x128xi32>
    %19 = arith.sitofp %18 : vector<128x128xi32> to vector<128x128xf32>
    %20 = arith.addf %14, %19 : vector<128x128xf32>
    %21 = vector.extract_strided_slice %0 {offsets = [0, 3], sizes = [128, 1], strides = [1, 1]} : vector<128x8xi32> to vector<128x1xi32>
    %22 = vector.broadcast %21 : vector<128x1xi32> to vector<128x128xi32>
    %23 = arith.cmpi eq, %22, %1 : vector<128x128xi32>
    %24 = arith.extui %23 : vector<128x128xi1> to vector<128x128xi32>
    %25 = arith.sitofp %24 : vector<128x128xi32> to vector<128x128xf32>
    %26 = arith.addf %20, %25 : vector<128x128xf32>
    %27 = vector.extract_strided_slice %0 {offsets = [0, 4], sizes = [128, 1], strides = [1, 1]} : vector<128x8xi32> to vector<128x1xi32>
    %28 = vector.broadcast %27 : vector<128x1xi32> to vector<128x128xi32>
    %29 = arith.cmpi eq, %28, %1 : vector<128x128xi32>
    %30 = arith.extui %29 : vector<128x128xi1> to vector<128x128xi32>
    %31 = arith.sitofp %30 : vector<128x128xi32> to vector<128x128xf32>
    %32 = arith.addf %26, %31 : vector<128x128xf32>
    %33 = vector.extract_strided_slice %0 {offsets = [0, 5], sizes = [128, 1], strides = [1, 1]} : vector<128x8xi32> to vector<128x1xi32>
    %34 = vector.broadcast %33 : vector<128x1xi32> to vector<128x128xi32>
    %35 = arith.cmpi eq, %34, %1 : vector<128x128xi32>
    %36 = arith.extui %35 : vector<128x128xi1> to vector<128x128xi32>
    %37 = arith.sitofp %36 : vector<128x128xi32> to vector<128x128xf32>
    %38 = arith.addf %32, %37 : vector<128x128xf32>
    %39 = vector.extract_strided_slice %0 {offsets = [0, 6], sizes = [128, 1], strides = [1, 1]} : vector<128x8xi32> to vector<128x1xi32>
    %40 = vector.broadcast %39 : vector<128x1xi32> to vector<128x128xi32>
    %41 = arith.cmpi eq, %40, %1 : vector<128x128xi32>
    %42 = arith.extui %41 : vector<128x128xi1> to vector<128x128xi32>
    %43 = arith.sitofp %42 : vector<128x128xi32> to vector<128x128xf32>
    %44 = arith.addf %38, %43 : vector<128x128xf32>
    %45 = vector.extract_strided_slice %0 {offsets = [0, 7], sizes = [128, 1], strides = [1, 1]} : vector<128x8xi32> to vector<128x1xi32>
    %46 = vector.broadcast %45 : vector<128x1xi32> to vector<128x128xi32>
    %47 = arith.cmpi eq, %46, %1 : vector<128x128xi32>
    %48 = arith.extui %47 : vector<128x128xi1> to vector<128x128xi32>
    %49 = arith.sitofp %48 : vector<128x128xi32> to vector<128x128xf32>
    %50 = arith.addf %44, %49 : vector<128x128xf32>
    %c0_1 = arith.constant 0 : index
    %c0_2 = arith.constant 0 : index
    %51 = vector.load %arg2[%c0_1, %c0_2] : memref<128x128xf32, #tpu.memory_space<vmem>>, vector<128x128xf32>
    %cst_3 = arith.constant dense<0.000000e+00> : vector<128x128xf32>
    %52 = tpu.matmul %50, %51, %cst_3 {dimension_numbers = #tpu.dot_dimension_numbers<[1], [0], [0], [1], [0, 0, 1, 1], [], []>} : vector<128x128xf32>, vector<128x128xf32>, vector<128x128xf32> -> vector<128x128xf32>
    %cst_4 = arith.constant dense<0xFF800000> : vector<128xf32>
    %53 = vector.multi_reduction <maximumf>, %52, %cst_4 [1] : vector<128x128xf32> to vector<128xf32>
    %54 = vector.shape_cast %53 : vector<128xf32> to vector<128x1xf32>
    %55 = vector.broadcast %54 : vector<128x1xf32> to vector<128x128xf32>
    %56 = arith.subf %52, %55 : vector<128x128xf32>
    %57 = math.exp %56 : vector<128x128xf32>
    %cst_5 = arith.constant dense<0.000000e+00> : vector<128xf32>
    %58 = vector.multi_reduction <add>, %57, %cst_5 [1] : vector<128x128xf32> to vector<128xf32>
    %59 = vector.shape_cast %58 : vector<128xf32> to vector<128x1xf32>
    %60 = math.log %59 : vector<128x1xf32>
    %61 = vector.broadcast %60 : vector<128x1xf32> to vector<128x128xf32>
    %62 = arith.subf %56, %61 : vector<128x128xf32>
    %c0_6 = arith.constant 0 : index
    %c0_7 = arith.constant 0 : index
    %63 = vector.load %arg3[%c0_6, %c0_7] : memref<128x128xf32, #tpu.memory_space<vmem>>, vector<128x128xf32>
    tpu.vector_store %arg3[%c0_6, %c0_7], %62 {strides = array<i32>} : memref<128x128xf32, #tpu.memory_space<vmem>>, vector<128x128xf32>,
    return
  }
  func.func @transform_0(%arg0: i32) -> (i32, i32) {
    %c0_i32 = arith.constant 0 : i32
    %c0_i32_0 = arith.constant 0 : i32
    return %arg0, %c0_i32 : i32, i32
  }
  func.func @transform_1(%arg0: i32) -> (i32, i32) {
    %c0_i32 = arith.constant 0 : i32
    %c0_i32_0 = arith.constant 0 : i32
    %c0_i32_1 = arith.constant 0 : i32
    return %c0_i32, %c0_i32_0 : i32, i32
  }
  func.func @transform_2(%arg0: i32) -> (i32, i32) {
    %c0_i32 = arith.constant 0 : i32
    %c0_i32_0 = arith.constant 0 : i32
    return %arg0, %c0_i32 : i32, i32
  }
}

</mosaic_0001>

<bundles_post_ra>
// kernel: tpu_custom_call.1
= control target key start
LH: loop header
LB: loop body
LE: loop exit
PB: predicated region body
PF: predicated region fallthrough
CT: control target
= control target key end

     0   :  { %7 = vsyncpa [#allocation3], 0  ;;  %s3010_s0 = inlined_call_operand.vmem [shape: s32[256,8], index: 0, kind: input, shape index: {}]   ;;  %s3011_s1 = inlined_call_operand.vmem [shape: f32[128,128], index: 1, kind: input, shape index: {}]   ;;  %s3012_s2 = inlined_call_operand.hbm [shape: f32[256,128], index: 2, kind: output, shape index: {}]  }
   0x1   :  { %9 = vsyncpa [#allocation3 + $0x1], 0  ;;  %s1997_s9 = smov 0   ;;  %s1999_s10 = smov 0  }
   0x2   :  { %s2001_s11 = smov 0   ;;  %s2003_s12 = smov 0  }
   0x3 LB: > { %s2018_s13 = sadd.s32 4294967295, %s1968_s12   ;;  %s1472_s14 = sadd.s32 4294967294, %s1968_s12   ;;  %s1968_s12 = sphi %s2003_s12, %s3058_s12   ;;  %s1964_s11 = sphi %s2001_s11, %s3057_s11   ;;  %s1960_s10 = sphi %s1999_s10, %s3056_s10   ;;  %s1956_s9 = sphi %s1997_s9, %s3055_s9  }
   0x4   : > { %s2022_s15 = sadd.s32 1, %s1968_s12   ;;  %s69_s16 = sadd.s32 1, %s1964_s11 }
   0x5   : > { %s66_s17 = ssub.s32 %s1968_s12, %s2022_s15  ;;  %p79_p0 = scmp.ne.s32.totalorder %s1964_s11, %s1960_s10 }
   0x6   : > { %p67_p1 = scmp.eq.s32.totalorder %s66_s17, 0  ;;  %p80_p2 = scmp.eq.s32.totalorder %s2018_s13, 1 }
   0x7   : > { %p85_p3 = scmp.ne.s32.totalorder %s1960_s10, %s1956_s9  ;;  %p86_p4 = scmp.eq.s32.totalorder %s1472_s14, 1 }
   0x8   : > { %s2033_s18 = scalar_select %p67_p1, %s1964_s11, %s69_s16  }
   0x9   : > { %p2035_p5 = por %p80_p2, %p79_p0  ;;  %p2039_p6 = por %p86_p4, %p85_p3 }
   0xa   : > { %p1475_p7 = scmp.ge.s32.totalorder %s1968_s12, 1  ;;  %p116_p8 = scmp.lt.s32.totalorder %s1968_s12, 3 }
   0xc   : > { %p117_p9 = pnand %p1475_p7, %p116_p8 }
   0xe   : > { %120 = sbr.rel (%p117_p9) target bundleno = 1056 (0x420), region = 28 }
  0x13   : > { %s1477_s21 = sshll.u32 %s2018_s13, 4  ;;  %v1970_v0 = vmov 0   ;;  %v1971_v17 = vmov 1   ;;  %v3021_v18 = vmov 2   ;;  %v3017_v19 = vmov 3   ;;  %v1074_v37 = vld [vmem:[%s3011_s1 + $0x78] sm:$0xff] }
  0x14   : > { %1784 = vset.pattern.permute.xlu1 %v1970_v0  ;;  %1783 = vset.pattern.permute.xlu0 %v1970_v0  ;;  %p139_p10 = scmp.lt.s32.totalorder %s1477_s21, 31  ;;  %v3019_v20 = vmov 4   ;;  %v3015_v21 = vmov 5   ;;  %v3022_v36 = vmov 6   ;;  %v1073_v40 = vld [vmem:[%s3011_s1 + $0x70] sm:$0xff]  ;;  %v1072_v41 = vld [vmem:[%s3011_s1 + $0x68] sm:$0xff] }
  0x15   : > { %1645 = vmatprep.subr.mxu0 %v1074_v37  ;;  %1701 = vmatprep.subr.mxu1 %v1074_v37  ;;  %v1071_v44 = vld [vmem:[%s3011_s1 + $0x60] sm:$0xff]  ;;  %v1070_v45 = vld [vmem:[%s3011_s1 + $0x58] sm:$0xff]  ;;  %v1069_v48 = vld [vmem:[%s3011_s1 + $0x50] sm:$0xff]  ;;  %v3013_v0 = vmov 7   ;;  %s1612_s23 = sshll.u32 %s2018_s13, 11  ;;  %s1979_s30 = smov [#allocation2]  }
  0x16   : > { %s3060_s21 = smov (!%p139_p10, %s1477_s21), 31  ;;  %1646 = vmatpush3.msra.mxu0 %v1074_v37  ;;  %1717 = vmatpush3.msra.mxu1 %v1074_v37  ;;  %v1068_v49 = vld [vmem:[%s3011_s1 + $0x48] sm:$0xff]  ;;  %v1067_v52 = vld [vmem:[%s3011_s1 + $0x40] sm:$0xff]  ;;  %v1066_v53 = vld [vmem:[%s3011_s1 + $0x38] sm:$0xff]  ;;  %s2961_s28 = scalar_lea.hbm %s3012_s2, %s1612_s23 }
  0x17   : > { %s1478_s22 = sshll.u32 %s3060_s21, 3  ;;  %1647 = vmatprep.subr.mxu0 %v1073_v40  ;;  %1702 = vmatprep.subr.mxu1 %v1073_v40  ;;  %v1065_v54 = vld [vmem:[%s3011_s1 + $0x30] sm:$0xff]  ;;  %v1064_v57 = vld [vmem:[%s3011_s1 + $0x28] sm:$0xff]  ;;  %v1063_v60 = vld [vmem:[%s3011_s1 + $0x20] sm:$0xff]  ;;  %s1912_s3 = sshll.u32 %s1979_s30, 4  ;;  %s1913_s3 = int_to_ptr.vmem [resolvable:$false] %s1912_s3 }
  0x18   : > { %s2049_s25 = scalar_lea.vmem %s3010_s0, %s1478_s22  ;;  %1648 = vmatpush3.msra.mxu0 %v1073_v40  ;;  %1718 = vmatpush3.msra.mxu1 %v1073_v40  ;;  %v1062_v61 = vld [vmem:[%s3011_s1 + $0x18] sm:$0xff]  ;;  %v1060_v40 = vld [vmem:[%s3011_s1 + $0x8] sm:$0xff]  ;;  %s1914_s4 = scalar_lea.vmem %s1913_s3, 4096 }
  0x19   : > { %v2052_v1 = vld [vmem:[%s2049_s25 + $0x10] sm:$0xff]  ;;  %v2055_v2 = vld [vmem:[%s2049_s25] sm:$0xff]  ;;  %v2060_v3 = vld [vmem:[%s2049_s25 + $0x18] sm:$0xff]  ;;  %1649 = vmatprep.subr.mxu0 %v1072_v41  ;;  %1703 = vmatprep.subr.mxu1 %v1072_v41 }
  0x1a   : > { %170 = vperm.xlu1 %1784, %v2052_v1   ;;  %164 = vperm.xlu0 %1783, %v2055_v2   ;;  %v2063_v4 = vld [vmem:[%s2049_s25 + $0x8] sm:$0xff]  ;;  %v2071_v6 = vld [vmem:[%s2049_s25 + $0x20] sm:$0xff]  ;;  %v2076_v7 = vld [vmem:[%s2049_s25 + $0x38] sm:$0xff] }
  0x1b   : > { %v2068_v5 = vld [vmem:[%s2049_s25 + $0x28] sm:$0xff]  ;;  %v2079_v8 = vld [vmem:[%s2049_s25 + $0x30] sm:$0xff]  ;;  %v2087_v10 = vld [vmem:[%s2049_s25 + $0x40] sm:$0xff]  ;;  %1650 = vmatpush3.msra.mxu0 %v1072_v41  ;;  %1719 = vmatpush3.msra.mxu1 %v1072_v41 }
  0x1c   : > { %v2084_v9 = vld [vmem:[%s2049_s25 + $0x48] sm:$0xff]  ;;  %v2092_v11 = vld [vmem:[%s2049_s25 + $0x58] sm:$0xff]  ;;  %v2095_v12 = vld [vmem:[%s2049_s25 + $0x50] sm:$0xff]  ;;  %1651 = vmatprep.subr.mxu0 %v1071_v44  ;;  %1704 = vmatprep.subr.mxu1 %v1071_v44 }
  0x1d   : > { %v2100_v13 = vld [vmem:[%s2049_s25 + $0x68] sm:$0xff]  ;;  %v2103_v14 = vld [vmem:[%s2049_s25 + $0x60] sm:$0xff]  ;;  %v2108_v15 = vld [vmem:[%s2049_s25 + $0x78] sm:$0xff]  ;;  %1652 = vmatpush3.msra.mxu0 %v1071_v44  ;;  %1720 = vmatpush3.msra.mxu1 %v1071_v44 }
  0x1e   : > { %173 = vperm.xlu1 %1784, %v2060_v3   ;;  %167 = vperm.xlu0 %1783, %v2063_v4   ;;  %v2111_v16 = vld [vmem:[%s2049_s25 + $0x70] sm:$0xff] }
  0x1f   : > { %1653 = vmatprep.subr.mxu0 %v1070_v45  ;;  %1705 = vmatprep.subr.mxu1 %v1070_v45 }
  0x20   : > { %1654 = vmatpush3.msra.mxu0 %v1070_v45  ;;  %1721 = vmatpush3.msra.mxu1 %v1070_v45 }
  0x21   : > { %1655 = vmatprep.subr.mxu0 %v1069_v48  ;;  %1706 = vmatprep.subr.mxu1 %v1069_v48 }
  0x22   : > { %179 = vperm.xlu1 %1784, %v2068_v5   ;;  %176 = vperm.xlu0 %1783, %v2071_v6  }
  0x23   : > { %1656 = vmatpush3.msra.mxu0 %v1069_v48  ;;  %1722 = vmatpush3.msra.mxu1 %v1069_v48 }
  0x24   : > { %1657 = vmatprep.subr.mxu0 %v1068_v49  ;;  %1707 = vmatprep.subr.mxu1 %v1068_v49 }
  0x25   : > { %1658 = vmatpush3.msra.mxu0 %v1068_v49  ;;  %1723 = vmatpush3.msra.mxu1 %v1068_v49 }
  0x26   : > { %185 = vperm.xlu1 %1784, %v2076_v7   ;;  %182 = vperm.xlu0 %1783, %v2079_v8  }
  0x27   : > { %1659 = vmatprep.subr.mxu0 %v1067_v52  ;;  %1708 = vmatprep.subr.mxu1 %v1067_v52 }
  0x28   : > { %1660 = vmatpush3.msra.mxu0 %v1067_v52  ;;  %1724 = vmatpush3.msra.mxu1 %v1067_v52 }
  0x29   : > { %1661 = vmatprep.subr.mxu0 %v1066_v53  ;;  %1709 = vmatprep.subr.mxu1 %v1066_v53 }
  0x2a   : > { %191 = vperm.xlu1 %1784, %v2084_v9   ;;  %188 = vperm.xlu0 %1783, %v2087_v10  }
  0x2b   : > { %1662 = vmatpush3.msra.mxu0 %v1066_v53  ;;  %1725 = vmatpush3.msra.mxu1 %v1066_v53 }
  0x2c   : > { %1663 = vmatprep.subr.mxu0 %v1065_v54  ;;  %1710 = vmatprep.subr.mxu1 %v1065_v54 }
  0x2d   : > { %1664 = vmatpush3.msra.mxu0 %v1065_v54  ;;  %1726 = vmatpush3.msra.mxu1 %v1065_v54 }
  0x2e   : > { %197 = vperm.xlu1 %1784, %v2092_v11   ;;  %194 = vperm.xlu0 %1783, %v2095_v12  }
  0x2f   : > { %1665 = vmatprep.subr.mxu0 %v1064_v57  ;;  %1711 = vmatprep.subr.mxu1 %v1064_v57 }
  0x30   : > { %1666 = vmatpush3.msra.mxu0 %v1064_v57  ;;  %1727 = vmatpush3.msra.mxu1 %v1064_v57 }
  0x31   : > { %1667 = vmatprep.subr.mxu0 %v1063_v60  ;;  %1712 = vmatprep.subr.mxu1 %v1063_v60 }
  0x32   : > { %203 = vperm.xlu1 %1784, %v2100_v13   ;;  %200 = vperm.xlu0 %1783, %v2103_v14  }
  0x33   : > { %1668 = vmatpush3.msra.mxu0 %v1063_v60  ;;  %1728 = vmatpush3.msra.mxu1 %v1063_v60 }
  0x34   : > { %1669 = vmatprep.subr.mxu0 %v1062_v61  ;;  %1713 = vmatprep.subr.mxu1 %v1062_v61 }
  0x35   : > { %1670 = vmatpush3.msra.mxu0 %v1062_v61  ;;  %1729 = vmatpush3.msra.mxu1 %v1062_v61  ;;  %v161_v61 = vlaneseq }
  0x36   : > { %209 = vperm.xlu1 %1784, %v2108_v15   ;;  %206 = vperm.xlu0 %1783, %v2111_v16  }
  0x3a   : > { %1786 = vset.pattern.permute.xlu1 %v1971_v17  ;;  %1785 = vset.pattern.permute.xlu0 %v1971_v17 }
  0x3b   : > { %279 = vperm.xlu1 %1786, %v2063_v4   ;;  %276 = vperm.xlu0 %1785, %v2055_v2  }
  0x3f   : > { %282 = vperm.xlu1 %1786, %v2052_v1   ;;  %285 = vperm.xlu0 %1785, %v2060_v3  }
  0x43   : > { %288 = vperm.xlu1 %1786, %v2071_v6   ;;  %291 = vperm.xlu0 %1785, %v2068_v5  }
  0x47   : > { %294 = vperm.xlu1 %1786, %v2079_v8   ;;  %297 = vperm.xlu0 %1785, %v2076_v7  }
  0x4b   : > { %300 = vperm.xlu1 %1786, %v2087_v10   ;;  %303 = vperm.xlu0 %1785, %v2084_v9  }
  0x4f   : > { %306 = vperm.xlu1 %1786, %v2095_v12   ;;  %309 = vperm.xlu0 %1785, %v2092_v11  }
  0x53   : > { %312 = vperm.xlu1 %1786, %v2103_v14   ;;  %315 = vperm.xlu0 %1785, %v2100_v13  }
  0x57   : > { %318 = vperm.xlu1 %1786, %v2111_v16   ;;  %321 = vperm.xlu0 %1785, %v2108_v15  }
  0x5b   : > { %1787 = vset.pattern.permute.xlu1 %v3021_v18  ;;  %1788 = vset.pattern.permute.xlu0 %v3021_v18 }
  0x5c   : > { %388 = vperm.xlu1 %1787, %v2055_v2   ;;  %412 = vperm.xlu0 %1788, %v2087_v10  }
  0x60   : > { %391 = vperm.xlu1 %1787, %v2063_v4   ;;  %418 = vperm.xlu0 %1788, %v2095_v12  }
  0x64   : > { %415 = vperm.xlu1 %1787, %v2084_v9   ;;  %397 = vperm.xlu0 %1788, %v2060_v3  }
  0x68   : > { %1789 = vset.pattern.permute.xlu1 %v3017_v19  ;;  %424 = vperm.xlu0 %1788, %v2103_v14  }
  0x69   : > { %524 = vperm.xlu1 %1789, %v2087_v10  }
  0x6c   : > { %427 = vperm.xlu0 %1788, %v2100_v13  }
  0x6d   : > { %503 = vperm.xlu1 %1789, %v2063_v4  }
  0x70   : > { %430 = vperm.xlu0 %1788, %v2111_v16  }
  0x71   : > { %1790 = vset.pattern.permute.xlu1 %v3021_v18 }
  0x72   : > { %394 = vperm.xlu1 %1790, %v2052_v1  }
  0x74   : > { %433 = vperm.xlu0 %1788, %v2108_v15  }
  0x76   : > { %1791 = vset.pattern.permute.xlu1 %v3019_v20 }
  0x77   : > { %612 = vperm.xlu1 %1791, %v2055_v2  }
  0x78   : > { %1814 = vset.pattern.permute.xlu0 %v3017_v19 }
  0x79   : > { %500 = vperm.xlu0 %1814, %v2055_v2  }
  0x7b   : > { %636 = vperm.xlu1 %1791, %v2087_v10  }
  0x7d   : > { %527 = vperm.xlu0 %1814, %v2084_v9  }
  0x7f   : > { %1792 = vset.pattern.permute.xlu1 %v3021_v18 }
  0x80   : > { %421 = vperm.xlu1 %1792, %v2092_v11  }
  0x81   : > { %530 = vperm.xlu0 %1814, %v2095_v12  }
  0x84   : > { %1793 = vset.pattern.permute.xlu1 %v3019_v20 }
  0x85   : > { %639 = vperm.xlu1 %1793, %v2084_v9   ;;  %509 = vperm.xlu0 %1814, %v2060_v3  }
  0x89   : > { %1794 = vset.pattern.permute.xlu1 %v3017_v19  ;;  %536 = vperm.xlu0 %1814, %v2103_v14  }
  0x8a   : > { %506 = vperm.xlu1 %1794, %v2052_v1  }
  0x8d   : > { %539 = vperm.xlu0 %1814, %v2100_v13  }
  0x8e   : > { %1795 = vset.pattern.permute.xlu1 %v3015_v21 }
  0x8f   : > { %724 = vperm.xlu1 %1795, %v2055_v2  }
  0x91   : > { %542 = vperm.xlu0 %1814, %v2111_v16  }
  0x93   : > { %748 = vperm.xlu1 %1795, %v2087_v10  }
  0x95   : > { %v2168_v22 = vpop.permute.xlu1 %170  ;;  %545 = vperm.xlu0 %1814, %v2108_v15   ;;  %v2171_v23 = vpop.permute.xlu0 %164 }
  0x97   : > { %1796 = vset.pattern.permute.xlu1 %v3017_v19 }
  0x98   : > { %533 = vperm.xlu1 %1796, %v2092_v11  }
  0x99   : > { %v2175_v24 = vpop.permute.xlu1 %173  ;;  %1821 = vset.pattern.permute.xlu0 %v3019_v20  ;;  %v2178_v25 = vpop.permute.xlu0 %167 }
  0x9a   : > { %615 = vperm.xlu0 %1821, %v2063_v4  }
  0x9c   : > { %1797 = vset.pattern.permute.xlu1 %v3015_v21 }
  0x9d   : > { %v2182_v26 = vpop.permute.xlu1 %179  ;;  %751 = vperm.xlu1 %1797, %v2084_v9   ;;  %v2185_v27 = vpop.permute.xlu0 %176 }
  0x9e   : > { %3028 = vst [vmem:[#allocation5_spill] sm:$0xff] %v2185_v27  ;;  %654 = vperm.xlu0 %1821, %v2111_v16  }
  0xa1   : > { %v2188_v28 = vpop.permute.xlu1 %185  ;;  %1798 = vset.pattern.permute.xlu1 %v3021_v18  ;;  %v2191_v29 = vpop.permute.xlu0 %182 }
  0xa2   : > { %400 = vperm.xlu1 %1798, %v2071_v6   ;;  %633 = vperm.xlu0 %1821, %v2076_v7  }
  0xa5   : > { %v2195_v30 = vpop.permute.xlu1 %191  ;;  %v2197_v31 = vpop.permute.xlu0 %188 }
  0xa6   : > { %1799 = vset.pattern.permute.xlu1 %v3019_v20  ;;  %1826 = vset.pattern.permute.xlu0 %v3015_v21 }
  0xa7   : > { %618 = vperm.xlu1 %1799, %v2052_v1   ;;  %727 = vperm.xlu0 %1826, %v2063_v4  }
  0xa9   : > { %v2203_v32 = vpop.permute.xlu1 %197  ;;  %v2205_v33 = vpop.permute.xlu0 %194 }
  0xaa   : > { %3029 = vst [vmem:[#allocation6_spill] sm:$0xff] %v2203_v32 }
  0xab   : > { %642 = vperm.xlu1 %1799, %v2095_v12   ;;  %766 = vperm.xlu0 %1826, %v2111_v16  }
  0xad   : > { %v2209_v34 = vpop.permute.xlu1 %203  ;;  %v2211_v35 = vpop.permute.xlu0 %200 }
  0xaf   : > { %1800 = vset.pattern.permute.xlu1 %v3022_v36  ;;  %745 = vperm.xlu0 %1826, %v2076_v7  }
  0xb0   : > { %860 = vperm.xlu1 %1800, %v2087_v10  }
  0xb1   : > { %v2219_v38 = vpop.permute.xlu1 %209  ;;  %v2221_v39 = vpop.permute.xlu0 %206 }
  0xb3   : > { %1831 = vset.pattern.permute.xlu0 %v3022_v36 }
  0xb4   : > { %1801 = vset.pattern.permute.xlu1 %v3021_v18  ;;  %836 = vperm.xlu0 %1831, %v2055_v2  }
  0xb5   : > { %403 = vperm.xlu1 %1801, %v2068_v5  }
  0xb6   : > { %v2233_v42 = vpop.permute.xlu1 %279  ;;  %v2235_v43 = vpop.permute.xlu0 %276 }
  0xb8   : > { %839 = vperm.xlu0 %1831, %v2063_v4  }
  0xb9   : > { %1802 = vset.pattern.permute.xlu1 %v3019_v20 }
  0xba   : > { %v2245_v46 = vpop.permute.xlu1 %282  ;;  %621 = vperm.xlu1 %1802, %v2060_v3   ;;  %v2248_v47 = vpop.permute.xlu0 %285 }
  0xbc   : > { %842 = vperm.xlu0 %1831, %v2052_v1  }
  0xbe   : > { %v2257_v50 = vpop.permute.xlu1 %288  ;;  %645 = vperm.xlu1 %1802, %v2092_v11   ;;  %v2260_v51 = vpop.permute.xlu0 %291 }
  0xbf   : > { %3030 = vst [vmem:[#allocation7_spill] sm:$0xff] %v2257_v50 }
  0xc0   : > { %845 = vperm.xlu0 %1831, %v2060_v3  }
  0xc2   : > { %v2272_v55 = vpop.permute.xlu1 %294  ;;  %1803 = vset.pattern.permute.xlu1 %v3022_v36  ;;  %v2275_v56 = vpop.permute.xlu0 %297 }
  0xc3   : > { %863 = vperm.xlu1 %1803, %v2084_v9  }
  0xc4   : > { %851 = vperm.xlu0 %1831, %v2068_v5  }
  0xc6   : > { %v2282_v58 = vpop.permute.xlu1 %300  ;;  %v2284_v59 = vpop.permute.xlu0 %303 }
  0xc7   : > { %1804 = vset.pattern.permute.xlu1 %v3017_v19 }
  0xc8   : > { %512 = vperm.xlu1 %1804, %v2071_v6   ;;  %878 = vperm.xlu0 %1831, %v2111_v16   ;;  %v1061_v16 = vld [vmem:[%s3011_s1 + $0x10] sm:$0xff] }
  0xc9   : > { %1671 = vmatprep.subr.mxu0 %v1061_v16  ;;  %1714 = vmatprep.subr.mxu1 %v1061_v16 }
  0xca   : > { %v2295_v62 = vpop.permute.xlu1 %306  ;;  %v2297_v63 = vpop.permute.xlu0 %309  ;;  %1672 = vmatpush3.msra.mxu0 %v1061_v16  ;;  %1730 = vmatpush3.msra.mxu1 %v1061_v16 }
  0xcb   : > { %1673 = vmatprep.subr.mxu0 %v1060_v40  ;;  %1715 = vmatprep.subr.mxu1 %v1060_v40 }
  0xcc   : > { %1805 = vset.pattern.permute.xlu1 %v3015_v21  ;;  %1835 = vset.pattern.permute.xlu0 %v3013_v0 }
  0xcd   : > { %730 = vperm.xlu1 %1805, %v2052_v1   ;;  %948 = vperm.xlu0 %1835, %v2055_v2   ;;  %v1059_v2 = vld [vmem:[%s3011_s1] sm:$0xff] }
  0xce   : > { %v2306_v17 = vpop.permute.xlu1 %312  ;;  %v2308_v37 = vpop.permute.xlu0 %315  ;;  %1674 = vmatpush3.msra.mxu0 %v1060_v40  ;;  %1731 = vmatpush3.msra.mxu1 %v1060_v40 }
  0xcf   : > { %1675 = vmatprep.subr.mxu0 %v1059_v2  ;;  %1716 = vmatprep.subr.mxu1 %v1059_v2 }
  0xd0   : > { %1676 = vmatpush3.msra.mxu0 %v1059_v2  ;;  %1732 = vmatpush3.msra.mxu1 %v1059_v2  ;;  %v2361_v2 = vand.u32 127, %v161_v61 }
  0xd1   : > { %754 = vperm.xlu1 %1805, %v2095_v12   ;;  %951 = vperm.xlu0 %1835, %v2063_v4  }
  0xd2   : > { %v2318_v41 = vpop.permute.xlu1 %318  ;;  %v2320_v44 = vpop.permute.xlu0 %321  ;;  %vm221_vm0 = vcmp.eq.s32.totalorder %v2205_v33, %v2361_v2  ;;  %vm333_vm1 = vcmp.eq.s32.totalorder %v2295_v62, %v2361_v2  ;;  %vm326_vm3 = vcmp.eq.s32.totalorder %v2248_v47, %v2361_v2  ;;  %vm214_vm4 = vcmp.eq.s32.totalorder %v2175_v24, %v2361_v2 }
  0xd3   : > { %vm223_vm6 = vcmp.eq.s32.totalorder %v2211_v35, %v2361_v2  ;;  %vm335_vm7 = vcmp.eq.s32.totalorder %v2306_v17, %v2361_v2  ;;  %vm336_vm10 = vcmp.eq.s32.totalorder %v2308_v37, %v2361_v2  ;;  %vm224_vm12 = vcmp.eq.s32.totalorder %v2209_v34, %v2361_v2 }
  0xd4   : > { %vm225_vm14 = vcmp.eq.s32.totalorder %v2221_v39, %v2361_v2  ;;  %vm337_vm15 = vcmp.eq.s32.totalorder %v2318_v41, %v2361_v2 }
  0xd5   : > { %1806 = vset.pattern.permute.xlu1 %v3013_v0  ;;  %954 = vperm.xlu0 %1835, %v2052_v1  }
  0xd6   : > { %972 = vperm.xlu1 %1806, %v2087_v10  }
  0xd7   : > { %v2325_v4 = vpop.permute.xlu1 %388  ;;  %v2327_v45 = vpop.permute.xlu0 %412 }
  0xd9   : > { %957 = vperm.xlu0 %1835, %v2060_v3  }
  0xda   : > { %1807 = vset.pattern.permute.xlu1 %v3017_v19 }
  0xdb   : > { %515 = vperm.xlu1 %1807, %v2068_v5   ;;  %v2332_v48 = vpop.permute.xlu1 %391  ;;  %v419_v1 = vpop.permute.xlu0 %418 }
  0xdc   : > { %vm445_vm2 = vcmp.eq.s32.totalorder %v419_v1, %v2361_v2 }
  0xdd   : > { %963 = vperm.xlu0 %1835, %v2068_v5  }
  0xdf   : > { %1808 = vset.pattern.permute.xlu1 %v3015_v21  ;;  %v2336_v10 = vpop.permute.xlu1 %415  ;;  %v398_v49 = vpop.permute.xlu0 %397  ;;  %v3024_v21 = vmov 0.0  }
  0xe0   : > { %733 = vperm.xlu1 %1808, %v2060_v3   ;;  %v1489_v61 = vsel %vm221_vm0, 1.0, %v3024_v21  ;;  %v1505_v19 = vsel %vm333_vm1, 1.0, %v3024_v21  ;;  %v1521_v33 = vsel %vm445_vm2, 1.0, %v3024_v21  ;;  %vm438_vm5 = vcmp.eq.s32.totalorder %v398_v49, %v2361_v2 }
  0xe1   : > { %966 = vperm.xlu0 %1835, %v2079_v8   ;;  %v381_v62 = vadd.f32 %v1505_v19, %v1489_v61  ;;  %v1482_v19 = vsel %vm214_vm4, 1.0, %v3024_v21  ;;  %v1514_v24 = vsel %vm438_vm5, 1.0, %v3024_v21  ;;  %v1491_v27 = vsel %vm223_vm6, 1.0, %v3024_v21 }
  0xe2   : > { %v1507_v35 = vsel %vm335_vm7, 1.0, %v3024_v21  ;;  %v1508_v37 = vsel %vm336_vm10, 1.0, %v3024_v21  ;;  %v1492_v34 = vsel %vm224_vm12, 1.0, %v3024_v21  ;;  %v1493_v41 = vsel %vm225_vm14, 1.0, %v3024_v21 }
  0xe3   : > { %v425_v52 = vpop.permute.xlu0 %424  ;;  %v493_v47 = vadd.f32 %v1521_v33, %v381_v62  ;;  %v383_v62 = vadd.f32 %v1507_v35, %v1491_v27  ;;  %v1509_v35 = vsel %vm337_vm15, 1.0, %v3024_v21  ;;  %vm338_vm2 = vcmp.eq.s32.totalorder %v2320_v44, %v2361_v2 }
  0xe4   : > { %757 = vperm.xlu1 %1808, %v2092_v11   ;;  %v2341_v53 = vpop.permute.xlu1 %524  ;;  %vm447_vm9 = vcmp.eq.s32.totalorder %v425_v52, %v2361_v2  ;;  %vm226_vm4 = vcmp.eq.s32.totalorder %v2219_v38, %v2361_v2  ;;  %v1510_v44 = vsel %vm338_vm2, 1.0, %v3024_v21  ;;  %vm211_vm10 = vcmp.eq.s32.totalorder %v2171_v23, %v2361_v2 }
  0xe5   : > { %993 = vperm.xlu0 %1835, %v2108_v15   ;;  %vm435_vm12 = vcmp.eq.s32.totalorder %v2325_v4, %v2361_v2  ;;  %vm331_vm14 = vcmp.eq.s32.totalorder %v2282_v58, %v2361_v2  ;;  %vm212_vm15 = vcmp.eq.s32.totalorder %v2178_v25, %v2361_v2  ;;  %vm325_vm2 = vcmp.eq.s32.totalorder %v2245_v46, %v2361_v2 }
  0xe7   : > { %v2344_v54 = vpop.permute.xlu0 %427 }
  0xe8   : > { %1809 = vset.pattern.permute.xlu1 %v3013_v0  ;;  %v2347_v57 = vpop.permute.xlu1 %503  ;;  %vm448_vm13 = vcmp.eq.s32.totalorder %v2344_v54, %v2361_v2 }
  0xe9   : > { %975 = vperm.xlu1 %1809, %v2084_v9   ;;  %v1524_v54 = vsel %vm448_vm13, 1.0, %v3024_v21  ;;  %vm219_vm13 = vcmp.eq.s32.totalorder %v2197_v31, %v2361_v2 }
  0xeb   : > { %v2350_v3 = vpop.permute.xlu0 %430 }
  0xec   : > { %vm449_vm1 = vcmp.eq.s32.totalorder %v2350_v3, %v2361_v2 }
  0xed   : > { %1810 = vset.pattern.permute.xlu1 %v3021_v18  ;;  %v2353_v60 = vpop.permute.xlu1 %394  ;;  %v1498_v18 = vsel %vm326_vm3, 1.0, %v3024_v21 }
  0xee   : > { %406 = vperm.xlu1 %1810, %v2079_v8   ;;  %v374_v61 = vadd.f32 %v1498_v18, %v1482_v19  ;;  %v1523_v18 = vsel %vm447_vm9, 1.0, %v3024_v21 }
  0xef   : > { %v2356_v16 = vpop.permute.xlu0 %433  ;;  %v495_v19 = vadd.f32 %v1523_v18, %v383_v62  ;;  %v1525_v18 = vsel %vm449_vm1, 1.0, %v3024_v21  ;;  %v385_v62 = vadd.f32 %v1509_v35, %v1493_v41 }
  0xf0   : > { %v486_v33 = vadd.f32 %v1514_v24, %v374_v61  ;;  %v3033_v24 = vmov 4   ;;  %v384_v61 = vadd.f32 %v1508_v37, %v1492_v34  ;;  %vm450_vm5 = vcmp.eq.s32.totalorder %v2356_v16, %v2361_v2 }
  0xf1   : > { %v1494_v34 = vsel %vm226_vm4, 1.0, %v3024_v21  ;;  %vm213_vm4 = vcmp.eq.s32.totalorder %v2168_v22, %v2361_v2 }
  0xf2   : > { %1811 = vset.pattern.permute.xlu1 %v3019_v20  ;;  %v2359_v40 = vpop.permute.xlu1 %612  ;;  %v386_v41 = vadd.f32 %v1510_v44, %v1494_v34  ;;  %v3038_v44 = vmov 5  }
  0xf3   : > { %624 = vperm.xlu1 %1811, %v2071_v6  }
  0xf4   : > { %v2364_v9 = vpop.permute.xlu0 %500 }
  0xf5   : > { %vm547_vm1 = vcmp.eq.s32.totalorder %v2364_v9, %v2361_v2 }
  0xf6   : > { %v2370_v0 = vpop.permute.xlu1 %636 }
  0xf7   : > { %648 = vperm.xlu1 %1811, %v2103_v14  }
  0xf8   : > { %v2376_v20 = vpop.permute.xlu0 %527 }
  0xfb   : > { %1812 = vset.pattern.permute.xlu1 %v3022_v36  ;;  %v2385_v1 = vpop.permute.xlu1 %421 }
  0xfc   : > { %3031 = vst [vmem:[#allocation8_spill] sm:$0xff] %v2385_v1  ;;  %866 = vperm.xlu1 %1812, %v2095_v12   ;;  %v531_v50 = vpop.permute.xlu0 %530  ;;  %v3032_v1 = vmov 2  }
  0xfd   : > { %vm557_vm8 = vcmp.eq.s32.totalorder %v531_v50, %v2361_v2 }
  0xfe   : > { %v1537_v49 = vsel %vm557_vm8, 1.0, %v3024_v21 }
  0xff   : > { %v2398_v36 = vadd.f32 %v1537_v49, %v493_v47 }
 0x100   : > { %1813 = vset.pattern.permute.xlu1 %v3032_v1  ;;  %v2403_v17 = vpop.permute.xlu1 %639  ;;  %v510_v50 = vpop.permute.xlu0 %509 }
 0x101   : > { %vm550_vm11 = vcmp.eq.s32.totalorder %v510_v50, %v2361_v2  ;;  %409 = vperm.xlu1 %1813, %v2076_v7  }
 0x102   : > { %v1530_v52 = vsel %vm550_vm11, 1.0, %v3024_v21  ;;  %vm323_vm11 = vcmp.eq.s32.totalorder %v2235_v43, %v2361_v2 }
 0x103   : > { %v2415_v1 = vadd.f32 %v1530_v52, %v486_v33  ;;  %v496_v33 = vadd.f32 %v1524_v54, %v384_v61  ;;  %v1526_v54 = vsel %vm450_vm5, 1.0, %v3024_v21  ;;  %v3034_v61 = vmov 6  }
 0x104   : > { %v537_v47 = vpop.permute.xlu0 %536  ;;  %vm436_vm5 = vcmp.eq.s32.totalorder %v2332_v48, %v2361_v2 }
 0x105   : > { %vm559_vm0 = vcmp.eq.s32.totalorder %v537_v47, %v2361_v2  ;;  %1815 = vset.pattern.permute.xlu1 %v3033_v24  ;;  %v2424_v27 = vpop.permute.xlu1 %506 }
 0x106   : > { %v1539_v49 = vsel %vm559_vm0, 1.0, %v3024_v21  ;;  %627 = vperm.xlu1 %1815, %v2068_v5   ;;  %vm324_vm0 = vcmp.eq.s32.totalorder %v2233_v42, %v2361_v2 }
 0x107   : > { %v2432_v39 = vadd.f32 %v1539_v49, %v495_v19  ;;  %v497_v19 = vadd.f32 %v1525_v18, %v385_v62 }
 0x108   : > { %v540_v50 = vpop.permute.xlu0 %539 }
 0x109   : > { %vm560_vm3 = vcmp.eq.s32.totalorder %v540_v50, %v2361_v2  ;;  %v498_v50 = vadd.f32 %v1526_v54, %v386_v41 }
 0x10a   : > { %v1540_v52 = vsel %vm560_vm3, 1.0, %v3024_v21  ;;  %651 = vperm.xlu1 %1815, %v2100_v13   ;;  %v2442_v3 = vpop.permute.xlu1 %724  ;;  %vm443_vm3 = vcmp.eq.s32.totalorder %v2327_v45, %v2361_v2 }
 0x10b   : > { %v2448_v37 = vadd.f32 %v1540_v52, %v496_v33  ;;  %v3036_v52 = vmov 3  }
 0x10c   : > { %v543_v47 = vpop.permute.xlu0 %542 }
 0x10d   : > { %vm561_vm6 = vcmp.eq.s32.totalorder %v543_v47, %v2361_v2 }
 0x10e   : > { %v1541_v49 = vsel %vm561_vm6, 1.0, %v3024_v21  ;;  %1816 = vset.pattern.permute.xlu1 %v3034_v61  ;;  %v2456_v38 = vpop.permute.xlu1 %748  ;;  %vm548_vm6 = vcmp.eq.s32.totalorder %v2347_v57, %v2361_v2 }
 0x10f   : > { %v609_v16 = vadd.f32 %v1541_v49, %v497_v19  ;;  %869 = vperm.xlu1 %1816, %v2092_v11  }
 0x110   : > { %v546_v35 = vpop.permute.xlu0 %545 }
 0x111   : > { %vm562_vm7 = vcmp.eq.s32.totalorder %v546_v35, %v2361_v2 }
 0x112   : > { %v1542_v33 = vsel %vm562_vm7, 1.0, %v3024_v21  ;;  %vm437_vm7 = vcmp.eq.s32.totalorder %v2353_v60, %v2361_v2 }
 0x113   : > { %v2461_v18 = vadd.f32 %v1542_v33, %v498_v50  ;;  %1817 = vset.pattern.permute.xlu1 %v3036_v52  ;;  %v2464_v62 = vpop.permute.xlu1 %533  ;;  %v3041_v50 = vmov 7  }
 0x114   : > { %3037 = vst [vmem:[#allocation10_spill] sm:$0xff] %v2464_v62  ;;  %518 = vperm.xlu1 %1817, %v2079_v8  }
 0x115   : > { %3035 = vst [vmem:[#allocation9_spill] sm:$0xff] %v2461_v18  ;;  %v2467_v47 = vpop.permute.xlu0 %615 }
 0x118   : > { %1818 = vset.pattern.permute.xlu1 %v3038_v44  ;;  %v2470_v19 = vpop.permute.xlu1 %751 }
 0x119   : > { %736 = vperm.xlu1 %1818, %v2071_v6   ;;  %v655_v34 = vpop.permute.xlu0 %654 }
 0x11a   : > { %vm673_vm8 = vcmp.eq.s32.totalorder %v655_v34, %v2361_v2 }
 0x11b   : > { %v1557_v54 = vsel %vm673_vm8, 1.0, %v3024_v21  ;;  %vm659_vm8 = vcmp.eq.s32.totalorder %v2359_v40, %v2361_v2 }
 0x11c   : > { %v721_v49 = vadd.f32 %v1557_v54, %v609_v16  ;;  %v3042_v16 = vmov 0.0  }
 0x11d   : > { %760 = vperm.xlu1 %1818, %v2103_v14   ;;  %v2476_v41 = vpop.permute.xlu1 %400  ;;  %v2478_v35 = vpop.permute.xlu0 %633  ;;  %v1511_v31 = vsel %vm435_vm12, 1.0, %v3042_v16  ;;  %v1487_v25 = vsel %vm219_vm13, 1.0, %v3042_v16  ;;  %v1503_v42 = vsel %vm331_vm14, 1.0, %v3042_v16  ;;  %v1496_v46 = vsel %vm324_vm0, 1.0, %v3042_v16 }
 0x11e   : > { %3039 = vst [vmem:[#allocation11_spill] sm:$0xff] %v2476_v41  ;;  %3040 = vst [vmem:[#allocation12_spill] sm:$0xff] %v2478_v35  ;;  %v1527_v58 = vsel %vm547_vm1, 1.0, %v3042_v16  ;;  %v1497_v4 = vsel %vm325_vm2, 1.0, %v3042_v16  ;;  %v1519_v9 = vsel %vm443_vm3, 1.0, %v3042_v16  ;;  %v1512_v48 = vsel %vm436_vm5, 1.0, %v3042_v16 }
 0x11f   : > { %v1513_v57 = vsel %vm437_vm7, 1.0, %v3042_v16  ;;  %v1543_v60 = vsel %vm659_vm8, 1.0, %v3042_v16  ;;  %vm660_vm12 = vcmp.eq.s32.totalorder %v2467_v47, %v2361_v2  ;;  %vm667_vm14 = vcmp.eq.s32.totalorder %v2370_v0, %v2361_v2 }
 0x120   : > { %vm779_vm5 = vcmp.eq.s32.totalorder %v2456_v38, %v2361_v2 }
 0x121   : > { %1819 = vset.pattern.permute.xlu1 %v3041_v50 }
 0x122   : > { %978 = vperm.xlu1 %1819, %v2095_v12   ;;  %v2482_v33 = vpop.permute.xlu1 %618  ;;  %v2484_v18 = vpop.permute.xlu0 %727 }
 0x123   : > { %vm661_vm0 = vcmp.eq.s32.totalorder %v2482_v33, %v2361_v2  ;;  %vm772_vm1 = vcmp.eq.s32.totalorder %v2484_v18, %v2361_v2  ;;  %v1551_v18 = vsel %vm667_vm14, 1.0, %v3042_v16  ;;  %vm444_vm14 = vcmp.eq.s32.totalorder %v2336_v10, %v2361_v2  ;;  %v1903_v10 = vld [vmem:[%s2049_s25 + $0x60] sm:$0xff] }
 0x126   : > { %1820 = vset.pattern.permute.xlu1 %v3036_v52  ;;  %v2487_v34 = vpop.permute.xlu1 %642  ;;  %v767_v21 = vpop.permute.xlu0 %766 }
 0x127   : > { %vm785_vm9 = vcmp.eq.s32.totalorder %v767_v21, %v2361_v2  ;;  %521 = vperm.xlu1 %1820, %v2076_v7  }
 0x128   : > { %v1573_v54 = vsel %vm785_vm9, 1.0, %v3042_v16  ;;  %vm771_vm9 = vcmp.eq.s32.totalorder %v2442_v3, %v2361_v2 }
 0x129   : > { %v2492_v41 = vadd.f32 %v1573_v54, %v721_v49  ;;  %v1495_v49 = vsel %vm323_vm11, 1.0, %v3042_v16  ;;  %vm549_vm11 = vcmp.eq.s32.totalorder %v2424_v27, %v2361_v2  ;;  %v1559_v27 = vsel %vm771_vm9, 1.0, %v3042_v16 }
 0x12a   : > { %v2494_v62 = vpop.permute.xlu0 %745 }
 0x12b   : > { %3043 = vst [vmem:[#allocation13_spill] sm:$0xff] %v2494_v62  ;;  %1822 = vset.pattern.permute.xlu1 %v3038_v44  ;;  %v2497_v12 = vpop.permute.xlu1 %860 }
 0x12c   : > { %739 = vperm.xlu1 %1822, %v2068_v5   ;;  %v1479_v5 = vsel %vm211_vm10, 1.0, %v3042_v16  ;;  %vm555_vm10 = vcmp.eq.s32.totalorder %v2341_v53, %v2361_v2  ;;  %vm891_vm7 = vcmp.eq.s32.totalorder %v2497_v12, %v2361_v2 }
 0x12d   : > { %v371_v23 = vadd.f32 %v1495_v49, %v1479_v5  ;;  %v1481_v5 = vsel %vm213_vm4, 1.0, %v3042_v16  ;;  %v379_v49 = vadd.f32 %v1503_v42, %v1487_v25  ;;  %v1529_v42 = vsel %vm549_vm11, 1.0, %v3042_v16 }
 0x12e   : > { %vm332_vm11 = vcmp.eq.s32.totalorder %v2284_v59, %v2361_v2 }
 0x12f   : > { %v2500_v52 = vpop.permute.xlu0 %836  ;;  %v483_v45 = vadd.f32 %v1511_v31, %v371_v23  ;;  %v373_v31 = vadd.f32 %v1497_v4, %v1481_v5  ;;  %v491_v32 = vadd.f32 %v1519_v9, %v379_v49  ;;  %v1560_v9 = vsel %vm772_vm1, 1.0, %v3042_v16 }
 0x130   : > { %763 = vperm.xlu1 %1822, %v2100_v13   ;;  %v2503_v35 = vpop.permute.xlu1 %403  ;;  %vm883_vm13 = vcmp.eq.s32.totalorder %v2500_v52, %v2361_v2  ;;  %v1544_v52 = vsel %vm660_vm12, 1.0, %v3042_v16  ;;  %v1504_v59 = vsel %vm332_vm11, 1.0, %v3042_v16  ;;  %vm668_vm1 = vcmp.eq.s32.totalorder %v2403_v17, %v2361_v2 }
 0x131   : > { %v595_v23 = vadd.f32 %v1527_v58, %v483_v45  ;;  %v485_v47 = vadd.f32 %v1513_v57, %v373_v31  ;;  %v1535_v58 = vsel %vm555_vm10, 1.0, %v3042_v16  ;;  %v1567_v57 = vsel %vm779_vm5, 1.0, %v3042_v16 }
 0x133   : > { %v2505_v21 = vpop.permute.xlu0 %839  ;;  %v597_v45 = vadd.f32 %v1529_v42, %v485_v47 }
 0x134   : > { %1823 = vset.pattern.permute.xlu1 %v3041_v50  ;;  %vm884_vm2 = vcmp.eq.s32.totalorder %v2505_v21, %v2361_v2 }
 0x135   : > { %981 = vperm.xlu1 %1823, %v2092_v11   ;;  %v2513_v7 = vpop.permute.xlu1 %621  ;;  %v1576_v0 = vsel %vm884_vm2, 1.0, %v3042_v16 }
 0x136   : > { %vm662_vm12 = vcmp.eq.s32.totalorder %v2513_v7, %v2361_v2 }
 0x137   : > { %v2517_v54 = vpop.permute.xlu0 %842  ;;  %v1546_v7 = vsel %vm662_vm12, 1.0, %v3042_v16 }
 0x139   : > { %1824 = vset.pattern.permute.xlu1 %v3033_v24  ;;  %v2526_v11 = vpop.permute.xlu1 %645 }
 0x13a   : > { %3044 = vst [vmem:[#allocation14_spill] sm:$0xff] %v2526_v11  ;;  %630 = vperm.xlu1 %1824, %v2079_v8   ;;  %v1480_v8 = vsel %vm212_vm15, 1.0, %v3042_v16 }
 0x13b   : > { %v2540_v43 = vpop.permute.xlu0 %845  ;;  %v372_v62 = vadd.f32 %v1496_v46, %v1480_v8  ;;  %v1575_v8 = vsel %vm883_vm13, 1.0, %v3042_v16  ;;  %vm220_vm13 = vcmp.eq.s32.totalorder %v2195_v30, %v2361_v2 }
 0x13d   : > { %v484_v25 = vadd.f32 %v1512_v48, %v372_v62  ;;  %v707_v62 = vadd.f32 %v1543_v60, %v595_v23 }
 0x13e   : > { %1825 = vset.pattern.permute.xlu1 %v3034_v61  ;;  %v2554_v22 = vpop.permute.xlu1 %863 }
 0x13f   : > { %848 = vperm.xlu1 %1825, %v2071_v6   ;;  %v2561_v11 = vpop.permute.xlu0 %851  ;;  %v1528_v6 = vsel %vm548_vm6, 1.0, %v3042_v16  ;;  %v819_v33 = vadd.f32 %v1559_v27, %v707_v62  ;;  %vm885_vm6 = vcmp.eq.s32.totalorder %v2517_v54, %v2361_v2  ;;  %v1583_v62 = vsel %vm891_vm7, 1.0, %v3042_v16 }
 0x140   : > { %v596_v4 = vadd.f32 %v1528_v6, %v484_v25  ;;  %v603_v25 = vadd.f32 %v1535_v58, %v491_v32  ;;  %v1577_v32 = vsel %vm885_vm6, 1.0, %v3042_v16  ;;  %vm892_vm5 = vcmp.eq.s32.totalorder %v2554_v22, %v2361_v2 }
 0x142   : > { %v708_v49 = vadd.f32 %v1544_v52, %v596_v4  ;;  %v715_v54 = vadd.f32 %v1551_v18, %v603_v25  ;;  %v1904_v25 = vld [vmem:[%s2049_s25 + $0x78] sm:$0xff] }
 0x143   : > { %872 = vperm.xlu1 %1825, %v2103_v14   ;;  %v2581_v40 = vpop.permute.xlu1 %512  ;;  %v879_v3 = vpop.permute.xlu0 %878 }
 0x144   : > { %vm897_vm15 = vcmp.eq.s32.totalorder %v879_v3, %v2361_v2  ;;  %v820_v31 = vadd.f32 %v1560_v9, %v708_v49  ;;  %v827_v42 = vadd.f32 %v1567_v57, %v715_v54  ;;  %v1584_v57 = vsel %vm892_vm5, 1.0, %v3042_v16  ;;  %v1905_v54 = vld [vmem:[%s2049_s25 + $0x68] sm:$0xff] }
 0x145   : > { %v1589_v14 = vsel %vm897_vm15, 1.0, %v3042_v16  ;;  %vm556_vm15 = vcmp.eq.s32.totalorder %v2376_v20, %v2361_v2  ;;  %v710_v20 = vadd.f32 %v1546_v7, %v2415_v1  ;;  %vm440_vm5 = vcmp.eq.s32.totalorder %v2503_v35, %v2361_v2 }
 0x146   : > { %v2596_v46 = vadd.f32 %v1589_v14, %v2492_v41  ;;  %v1545_v41 = vsel %vm661_vm0, 1.0, %v3042_v16  ;;  %v932_v60 = vadd.f32 %v1576_v0, %v820_v31  ;;  %v939_v58 = vadd.f32 %v1583_v62, %v827_v42 }
 0x147   : > { %1827 = vset.pattern.permute.xlu1 %v3033_v24  ;;  %v931_v24 = vadd.f32 %v1575_v8, %v819_v33  ;;  %v709_v23 = vadd.f32 %v1545_v41, %v597_v45  ;;  %v1901_v8 = vld [vmem:[%s2049_s25 + $0x30] sm:$0xff]  ;;  %v1902_v41 = vld [vmem:[%s2049_s25 + $0x20] sm:$0xff]  ;;  %vm886_vm0 = vcmp.eq.s32.totalorder %v2540_v43, %v2361_v2 }
 0x148   : > { %657 = vperm.xlu1 %1827, %v2108_v15   ;;  %v731_v53 = vpop.permute.xlu1 %730  ;;  %v949_v5 = vpop.permute.xlu0 %948  ;;  %v1578_v43 = vsel %vm886_vm0, 1.0, %v3042_v16  ;;  %vm330_vm0 = vcmp.eq.s32.totalorder %v2275_v56, %v2361_v2 }
 0x149   : > { %vm773_vm3 = vcmp.eq.s32.totalorder %v731_v53, %v2361_v2  ;;  %vm995_vm4 = vcmp.eq.s32.totalorder %v949_v5, %v2361_v2  ;;  %v1488_v53 = vsel %vm220_vm13, 1.0, %v3042_v16  ;;  %v1520_v5 = vsel %vm444_vm14, 1.0, %v3042_v16 }
 0x14a   : > { %v1561_v21 = vsel %vm773_vm3, 1.0, %v3042_v16  ;;  %v1591_v48 = vsel %vm995_vm4, 1.0, %v3042_v16  ;;  %v380_v30 = vadd.f32 %v1504_v59, %v1488_v53  ;;  %vm780_vm4 = vcmp.eq.s32.totalorder %v2470_v19, %v2361_v2 }
 0x14b   : > { %v1043_v15 = vadd.f32 %v1591_v48, %v931_v24  ;;  %v821_v3 = vadd.f32 %v1561_v21, %v709_v23  ;;  %v1536_v24 = vsel %vm556_vm15, 1.0, %v3042_v16  ;;  %v1552_v21 = vsel %vm668_vm1, 1.0, %v3042_v16 }
 0x14c   : > { %1828 = vset.pattern.permute.xlu1 %v3034_v61  ;;  %v2624_v6 = vpop.permute.xlu1 %754  ;;  %v952_v38 = vpop.permute.xlu0 %951  ;;  %v492_v0 = vadd.f32 %v1520_v5, %v380_v30  ;;  %v1568_v19 = vsel %vm780_vm4, 1.0, %v3042_v16  ;;  %vm669_vm13 = vcmp.eq.s32.totalorder %v2487_v34, %v2361_v2  ;;  %vm216_vm1 = vcmp.eq.s32.totalorder %v2182_v26, %v2361_v2 }
 0x14d   : > { %vm996_vm8 = vcmp.eq.s32.totalorder %v952_v38, %v2361_v2  ;;  %875 = vperm.xlu1 %1828, %v2100_v13   ;;  %1677 = vmatprep.mubr.f32.mxu0 %v1043_v15  ;;  %v933_v47 = vadd.f32 %v1577_v32, %v821_v3  ;;  %vm781_vm14 = vcmp.eq.s32.totalorder %v2624_v6, %v2361_v2  ;;  %v1553_v5 = vsel %vm669_vm13, 1.0, %v3042_v16 }
 0x14e   : > { %v1592_v12 = vsel %vm996_vm8, 1.0, %v3042_v16  ;;  %v604_v23 = vadd.f32 %v1536_v24, %v492_v0  ;;  %v1484_v26 = vsel %vm216_vm1, 1.0, %v3042_v16 }
 0x14f   : > { %v1044_v27 = vadd.f32 %v1592_v12, %v932_v60 }
 0x150   : > { %v955_v14 = vpop.permute.xlu0 %954  ;;  %v716_v38 = vadd.f32 %v1552_v21, %v604_v23  ;;  %v3046_v21 = vld [vmem:[#allocation12_spill] sm:$0xff] }
 0x151   : > { %vm997_vm9 = vcmp.eq.s32.totalorder %v955_v14, %v2361_v2  ;;  %1829 = vset.pattern.permute.xlu1 %v3038_v44  ;;  %v973_v52 = vpop.permute.xlu1 %972  ;;  %1678 = vmatmul.mubr.f32.vlgmr.msra.gmra.mxu0 %v1044_v27  ;;  %v1906_v27 = vld [vmem:[%s2049_s25 + $0x38] sm:$0xff] }
 0x152   : > { %v1593_v13 = vsel %vm997_vm9, 1.0, %v3042_v16  ;;  %vm1003_vm10 = vcmp.eq.s32.totalorder %v973_v52, %v2361_v2  ;;  %742 = vperm.xlu1 %1829, %v1901_v8   ;;  %v828_v3 = vadd.f32 %v1568_v19, %v716_v38  ;;  %vm217_vm9 = vcmp.eq.s32.totalorder %v2191_v29, %v2361_v2  ;;  %v3048_v19 = vld [vmem:[#allocation13_spill] sm:$0xff] }
 0x153   : > { %v1045_v4 = vadd.f32 %v1593_v13, %v933_v47  ;;  %v1599_v33 = vsel %vm1003_vm10, 1.0, %v3042_v16  ;;  %v1907_v13 = vld [vmem:[%s2049_s25 + $0x70] sm:$0xff]  ;;  %vm329_vm10 = vcmp.eq.s32.totalorder %v2272_v55, %v2361_v2  ;;  %vm778_vm13 = vcmp.eq.s32.totalorder %v3048_v19, %v2361_v2  ;;  %s135_s25 = sand.u32 1, %s1960_s10  }
 0x154   : > { %v1051_v18 = vadd.f32 %v1599_v33, %v939_v58  ;;  %v958_v9 = vpop.permute.xlu0 %957  ;;  %s1476_s21 = sshll.u32 %s135_s25, 7  ;;  %s2970_s13 = scalar_lea.sflag [#allocation3], %s135_s25 }
 0x155   : > { %1680 = vmatprep.mubr.f32.mxu0 %v1045_v4  ;;  %vm998_vm3 = vcmp.eq.s32.totalorder %v958_v9, %v2361_v2  ;;  %s2926_s22 = scalar_lea.vmem [#allocation2], %s1476_s21 }
 0x156   : > { %1830 = vset.pattern.permute.xlu1 %v3041_v50  ;;  %v2643_v45 = vpop.permute.xlu1 %515  ;;  %1689 = vmatprep.mubr.f32.mxu1 %v1051_v18  ;;  %v1594_v31 = vsel %vm998_vm3, 1.0, %v3042_v16  ;;  %v1485_v18 = vsel %vm217_vm9, 1.0, %v3042_v16  ;;  %vm218_vm3 = vcmp.eq.s32.totalorder %v2188_v28, %v2361_v2  ;;  %s1410_s24 = sshll.u32 %s2926_s22, 4  ;;  %s2963_s24 = int_to_ptr.vmem [resolvable:$true] %s1410_s24 }
 0x157   : > { %960 = vperm.xlu1 %1830, %v1902_v41   ;;  %v1501_v41 = vsel %vm329_vm10, 1.0, %v3042_v16  ;;  %vm666_vm10 = vcmp.eq.s32.totalorder %v3046_v21, %v2361_v2  ;;  %s1908_s29 = scalar_lea.vmem %s2963_s24, 2048  ;;  %p1915_p0 = scmp.lt.s32.totalorder %s2963_s24, %s1913_s3 }
 0x158   : > { %v377_v7 = vadd.f32 %v1501_v41, %v1485_v18  ;;  %p1909_p11 = scmp.ne.s32.totalorder %s2963_s24, %s1908_s29  ;;  %p1916_p1 = scmp.lt.s32.totalorder %s1914_s4, %s1908_s29 }
 0x15a   : > { %p1910_p12 = pnand %p1909_p11, %p2035_p5  ;;  %p1917_p2 = por %p1916_p1, %p1915_p0 }
 0x15b   : > { %984 = vperm.xlu1 %1830, %v1903_v10   ;;  %v734_v49 = vpop.permute.xlu1 %733  ;;  %v1569_v10 = vsel %vm781_vm14, 1.0, %v3042_v16 }
 0x15c   : > { %vm774_vm2 = vcmp.eq.s32.totalorder %v734_v49, %v2361_v2  ;;  %v717_v49 = vadd.f32 %v1553_v5, %v2398_v36  ;;  %v1502_v36 = vsel %vm330_vm0, 1.0, %v3042_v16  ;;  %vm888_vm0 = vcmp.eq.s32.totalorder %v2561_v11, %v2361_v2  ;;  %p1911_p13 = pneg %p1910_p12 }
 0x15d   : > { %v1562_v17 = vsel %vm774_vm2, 1.0, %v3042_v16  ;;  %vm328_vm2 = vcmp.eq.s32.totalorder %v2260_v51, %v2361_v2  ;;  %v1486_v51 = vsel %vm218_vm3, 1.0, %v3042_v16 }
 0x15e   : > { %v822_v48 = vadd.f32 %v1562_v17, %v710_v20  ;;  %v829_v6 = vadd.f32 %v1569_v10, %v717_v49  ;;  %v1500_v20 = vsel %vm328_vm2, 1.0, %v3042_v16  ;;  %v378_v17 = vadd.f32 %v1502_v36, %v1486_v51  ;;  %p1918_p3 = pnand %p1917_p2, %p1911_p13 }
 0x15f   : > { %1832 = vset.pattern.permute.xlu1 %v3038_v44  ;;  %v2673_v1 = vpop.permute.xlu1 %757  ;;  %v940_v44 = vadd.f32 %v1584_v57, %v828_v3  ;;  %v1550_v57 = vsel %vm666_vm10, 1.0, %v3042_v16 }
 0x160   : > { %v934_v15 = vadd.f32 %v1578_v43, %v822_v48  ;;  %769 = vperm.xlu1 %1832, %v1904_v25   ;;  %v3045_v43 = vld [vmem:[#allocation6_spill] sm:$0xff]  ;;  %v1516_v48 = vsel %vm440_vm5, 1.0, %v3042_v16  ;;  %vm782_vm3 = vcmp.eq.s32.totalorder %v2673_v1, %v2361_v2 }
 0x161   : > { %vm222_vm9 = vcmp.eq.s32.totalorder %v3045_v43, %v2361_v2 }
 0x162   : > { %v1046_v60 = vadd.f32 %v1594_v31, %v934_v15  ;;  %v3047_v31 = vld [vmem:[#allocation8_spill] sm:$0xff]  ;;  %v1490_v38 = vsel %vm222_vm9, 1.0, %v3042_v16  ;;  %vm551_vm9 = vcmp.eq.s32.totalorder %v2581_v40, %v2361_v2 }
 0x163   : > { %v1531_v21 = vsel %vm551_vm9, 1.0, %v3042_v16 }
 0x164   : > { %1833 = vset.pattern.permute.xlu1 %v3041_v50  ;;  %v976_v22 = vpop.permute.xlu1 %975  ;;  %1681 = vmatmul.mubr.f32.gmra.mxu0 %v1046_v60 }
 0x165   : > { %vm1004_vm6 = vcmp.eq.s32.totalorder %v976_v22, %v2361_v2  ;;  %987 = vperm.xlu1 %1833, %v1905_v54  }
 0x166   : > { %v1600_v32 = vsel %vm1004_vm6, 1.0, %v3042_v16 }
 0x167   : > { %v1052_v12 = vadd.f32 %v1600_v32, %v940_v44  ;;  %v3049_v44 = vld [vmem:[#allocation10_spill] sm:$0xff] }
 0x169   : > { %1834 = vset.pattern.permute.xlu1 %v3034_v61  ;;  %v407_v62 = vpop.permute.xlu1 %406  ;;  %1690 = vmatmul.mubr.f32.vlgmr.msra.gmra.mxu1 %v1052_v12 }
 0x16a   : > { %854 = vperm.xlu1 %1834, %v1901_v8   ;;  %vm441_vm11 = vcmp.eq.s32.totalorder %v407_v62, %v2361_v2  ;;  %v1566_v62 = vsel %vm778_vm13, 1.0, %v3042_v16 }
 0x16b   : > { %v1517_v59 = vsel %vm441_vm11, 1.0, %v3042_v16  ;;  %vm446_vm11 = vcmp.eq.s32.totalorder %v3047_v31, %v2361_v2  ;;  %v964_v31 = vpop.permute.xlu0 %963 }
 0x16c   : > { %v489_v53 = vadd.f32 %v1517_v59, %v377_v7  ;;  %v1522_v22 = vsel %vm446_vm11, 1.0, %v3042_v16 }
 0x16e   : > { %857 = vperm.xlu1 %1834, %v1906_v27   ;;  %v2685_v42 = vpop.permute.xlu1 %624 }
 0x16f   : > { %vm663_vm10 = vcmp.eq.s32.totalorder %v2685_v42, %v2361_v2 }
 0x172   : > { %881 = vperm.xlu1 %1834, %v1904_v25   ;;  %v649_v14 = vpop.permute.xlu1 %648 }
 0x173   : > { %vm671_vm7 = vcmp.eq.s32.totalorder %v649_v14, %v2361_v2  ;;  %v3050_v14 = vld [vmem:[#allocation14_spill] sm:$0xff] }
 0x174   : > { %v1555_v47 = vsel %vm671_vm7, 1.0, %v3042_v16  ;;  %vm334_vm7 = vcmp.eq.s32.totalorder %v2297_v63, %v2361_v2  ;;  %v376_v63 = vadd.f32 %v1500_v20, %v1484_v26  ;;  %vm670_vm1 = vcmp.eq.s32.totalorder %v3050_v14, %v2361_v2  ;;  %v3052_v26 = vld [vmem:[#allocation7_spill] sm:$0xff] }
 0x175   : > { %v2690_v52 = vadd.f32 %v1555_v47, %v2432_v39  ;;  %v1506_v23 = vsel %vm334_vm7, 1.0, %v3042_v16  ;;  %v1554_v18 = vsel %vm670_vm1, 1.0, %v3042_v16  ;;  %vm327_vm7 = vcmp.eq.s32.totalorder %v3052_v26, %v2361_v2 }
 0x176   : > { %1836 = vset.pattern.permute.xlu1 %v3041_v50  ;;  %v488_v60 = vadd.f32 %v1516_v48, %v376_v63  ;;  %v382_v12 = vadd.f32 %v1506_v23, %v1490_v38  ;;  %v1547_v63 = vsel %vm663_vm10, 1.0, %v3042_v16 }
 0x177   : > { %990 = vperm.xlu1 %1836, %v1907_v13   ;;  %v867_v61 = vpop.permute.xlu1 %866 }
 0x178   : > { %vm893_vm15 = vcmp.eq.s32.totalorder %v867_v61, %v2361_v2  ;;  %v494_v61 = vadd.f32 %v1522_v22, %v382_v12 }
 0x179   : > { %v1585_v34 = vsel %vm893_vm15, 1.0, %v3042_v16  ;;  %vm558_vm15 = vcmp.eq.s32.totalorder %v3049_v44, %v2361_v2 }
 0x17a   : > { %v941_v56 = vadd.f32 %v1585_v34, %v829_v6 }
 0x17b   : > { %969 = vperm.xlu1 %1836, %v1906_v27  }
 0x17c   : > { %v410_v8 = vpop.permute.xlu1 %409 }
 0x17d   : > { %vm442_vm4 = vcmp.eq.s32.totalorder %v410_v8, %v2361_v2  ;;  %v1538_v8 = vsel %vm558_vm15, 1.0, %v3042_v16 }
 0x17e   : > { %v1518_v0 = vsel %vm442_vm4, 1.0, %v3042_v16  ;;  %v606_v59 = vadd.f32 %v1538_v8, %v494_v61 }
 0x17f   : > { %v490_v25 = vadd.f32 %v1518_v0, %v378_v17  ;;  %v1499_v0 = vsel %vm327_vm7, 1.0, %v3042_v16 }
 0x181   : > { %v2694_v58 = vpop.permute.xlu1 %627 }
 0x185   : > { %v652_v4 = vpop.permute.xlu1 %651 }
 0x186   : > { %vm672_vm8 = vcmp.eq.s32.totalorder %v652_v4, %v2361_v2  ;;  %v1580_v4 = vsel %vm888_vm0, 1.0, %v3042_v16 }
 0x187   : > { %v1556_v33 = vsel %vm672_vm8, 1.0, %v3042_v16  ;;  %vm552_vm8 = vcmp.eq.s32.totalorder %v2643_v45, %v2361_v2 }
 0x188   : > { %v2703_v39 = vadd.f32 %v1556_v33, %v2448_v37  ;;  %v1532_v15 = vsel %vm552_vm8, 1.0, %v3042_v16 }
 0x189   : > { %v600_v27 = vadd.f32 %v1532_v15, %v488_v60 }
 0x18a   : > { %v2706_v50 = vpop.permute.xlu1 %869 }
 0x18b   : > { %vm894_vm4 = vcmp.eq.s32.totalorder %v2706_v50, %v2361_v2 }
 0x18c   : > { %v1586_v5 = vsel %vm894_vm4, 1.0, %v3042_v16 }
 0x18f   : > { %v519_v9 = vpop.permute.xlu1 %518 }
 0x190   : > { %vm553_vm12 = vcmp.eq.s32.totalorder %v519_v9, %v2361_v2  ;;  %v1570_v9 = vsel %vm782_vm3, 1.0, %v3042_v16 }
 0x191   : > { %v1533_v29 = vsel %vm553_vm12, 1.0, %v3042_v16  ;;  %vm664_vm12 = vcmp.eq.s32.totalorder %v2694_v58, %v2361_v2 }
 0x192   : > { %v2713_v55 = vadd.f32 %v1533_v29, %v489_v53  ;;  %v1548_v54 = vsel %vm664_vm12, 1.0, %v3042_v16  ;;  %v718_v29 = vadd.f32 %v1554_v18, %v606_v59 }
 0x193   : > { %v712_v58 = vadd.f32 %v1548_v54, %v600_v27 }
 0x194   : > { %v2717_v37 = vpop.permute.xlu1 %736  ;;  %v830_v1 = vadd.f32 %v1570_v9, %v718_v29 }
 0x195   : > { %vm775_vm11 = vcmp.eq.s32.totalorder %v2717_v37, %v2361_v2 }
 0x196   : > { %v942_v49 = vadd.f32 %v1586_v5, %v830_v1 }
 0x198   : > { %v2723_v30 = vpop.permute.xlu1 %760 }
 0x199   : > { %vm783_vm13 = vcmp.eq.s32.totalorder %v2723_v30, %v2361_v2 }
 0x19a   : > { %v1571_v37 = vsel %vm783_vm13, 1.0, %v3042_v16 }
 0x19b   : > { %v831_v30 = vadd.f32 %v1571_v37, %v2690_v52 }
 0x19d   : > { %v979_v24 = vpop.permute.xlu1 %978 }
 0x19e   : > { %vm1005_vm6 = vcmp.eq.s32.totalorder %v979_v24, %v2361_v2 }
 0x19f   : > { %v1601_v28 = vsel %vm1005_vm6, 1.0, %v3042_v16 }
 0x1a0   : > { %v1053_v35 = vadd.f32 %v1601_v28, %v941_v56  ;;  %v3051_v56 = vld [vmem:[#allocation5_spill] sm:$0xff]  ;;  %v3053_v28 = vld [vmem:[#allocation11_spill] sm:$0xff] }
 0x1a1   : > { %vm215_vm6 = vcmp.eq.s32.totalorder %v3051_v56, %v2361_v2  ;;  %vm439_vm8 = vcmp.eq.s32.totalorder %v3053_v28, %v2361_v2 }
 0x1a2   : > { %v522_v45 = vpop.permute.xlu1 %521  ;;  %1692 = vmatprep.mubr.f32.mxu1 %v1053_v35  ;;  %v1483_v51 = vsel %vm215_vm6, 1.0, %v3042_v16  ;;  %v1515_v35 = vsel %vm439_vm8, 1.0, %v3042_v16 }
 0x1a3   : > { %vm554_vm14 = vcmp.eq.s32.totalorder %v522_v45, %v2361_v2  ;;  %v375_v17 = vadd.f32 %v1499_v0, %v1483_v51  ;;  %v1563_v45 = vsel %vm775_vm11, 1.0, %v3042_v16 }
 0x1a4   : > { %v1534_v3 = vsel %vm554_vm14, 1.0, %v3042_v16  ;;  %vm1000_vm14 = vcmp.eq.s32.totalorder %v964_v31, %v2361_v2 }
 0x1a5   : > { %v602_v32 = vadd.f32 %v1534_v3, %v490_v25  ;;  %v487_v48 = vadd.f32 %v1515_v35, %v375_v17  ;;  %v1596_v38 = vsel %vm1000_vm14, 1.0, %v3042_v16 }
 0x1a7   : > { %v714_v47 = vadd.f32 %v1550_v57, %v602_v32  ;;  %v740_v13 = vpop.permute.xlu1 %739  ;;  %v599_v23 = vadd.f32 %v1531_v21, %v487_v48 }
 0x1a8   : > { %vm776_vm2 = vcmp.eq.s32.totalorder %v740_v13, %v2361_v2 }
 0x1a9   : > { %v1564_v33 = vsel %vm776_vm2, 1.0, %v3042_v16  ;;  %v2782_v11 = vadd.f32 %v1566_v62, %v714_v47  ;;  %v711_v19 = vadd.f32 %v1547_v63, %v599_v23 }
 0x1aa   : > { %v824_v41 = vadd.f32 %v1564_v33, %v712_v58 }
 0x1ab   : > { %v2787_v7 = vpop.permute.xlu1 %763  ;;  %v823_v15 = vadd.f32 %v1563_v45, %v711_v19 }
 0x1ac   : > { %v936_v53 = vadd.f32 %v1580_v4, %v824_v41  ;;  %vm784_vm2 = vcmp.eq.s32.totalorder %v2787_v7, %v2361_v2  ;;  %v967_v41 = vpop.permute.xlu0 %966 }
 0x1ad   : > { %v1572_v52 = vsel %vm784_vm2, 1.0, %v3042_v16  ;;  %vm1001_vm7 = vcmp.eq.s32.totalorder %v967_v41, %v2361_v2 }
 0x1ae   : > { %v1048_v44 = vadd.f32 %v1596_v38, %v936_v53  ;;  %v832_v47 = vadd.f32 %v1572_v52, %v2703_v39  ;;  %v1597_v53 = vsel %vm1001_vm7, 1.0, %v3042_v16 }
 0x1b0   : > { %v982_v10 = vpop.permute.xlu1 %981 }
 0x1b1   : > { %vm1006_vm5 = vcmp.eq.s32.totalorder %v982_v10, %v2361_v2 }
 0x1b2   : > { %v1602_v34 = vsel %vm1006_vm5, 1.0, %v3042_v16 }
 0x1b3   : > { %v1054_v6 = vadd.f32 %v1602_v34, %v942_v49  ;;  %v3054_v49 = vld [vmem:[#allocation9_spill] sm:$0xff] }
 0x1b5   : > { %v631_v24 = vpop.permute.xlu1 %630  ;;  %1693 = vmatmul.mubr.f32.gmra.mxu1 %v1054_v6  ;;  %v994_v6 = vpop.permute.xlu0 %993 }
 0x1b6   : > { %vm665_vm4 = vcmp.eq.s32.totalorder %v631_v24, %v2361_v2  ;;  %vm1010_vm13 = vcmp.eq.s32.totalorder %v994_v6, %v2361_v2 }
 0x1b7   : > { %v1549_v61 = vsel %vm665_vm4, 1.0, %v3042_v16  ;;  %v1606_v28 = vsel %vm1010_vm13, 1.0, %v3042_v16 }
 0x1b8   : > { %v713_v18 = vadd.f32 %v1549_v61, %v2713_v55 }
 0x1ba   : > { %v849_v36 = vpop.permute.xlu1 %848 }
 0x1bb   : > { %vm887_vm12 = vcmp.eq.s32.totalorder %v849_v36, %v2361_v2 }
 0x1bc   : > { %v1579_v42 = vsel %vm887_vm12, 1.0, %v3042_v16 }
 0x1bd   : > { %v935_v57 = vadd.f32 %v1579_v42, %v823_v15 }
 0x1be   : > { %v873_v50 = vpop.permute.xlu1 %872 }
 0x1bf   : > { %vm895_vm15 = vcmp.eq.s32.totalorder %v873_v50, %v2361_v2 }
 0x1c0   : > { %v1587_v60 = vsel %vm895_vm15, 1.0, %v3042_v16 }
 0x1c1   : > { %v943_v32 = vadd.f32 %v1587_v60, %v831_v30 }
 0x1c3   : > { %v2797_v20 = vpop.permute.xlu1 %657 }
 0x1c4   : > { %vm674_vm9 = vcmp.eq.s32.totalorder %v2797_v20, %v2361_v2 }
 0x1c5   : > { %v1558_v5 = vsel %vm674_vm9, 1.0, %v3042_v16 }
 0x1c6   : > { %v722_v34 = vadd.f32 %v1558_v5, %v3054_v49 }
 0x1c8   : > { %v876_v43 = vpop.permute.xlu1 %875 }
 0x1c9   : > { %vm896_vm3 = vcmp.eq.s32.totalorder %v876_v43, %v2361_v2 }
 0x1ca   : > { %v1588_v14 = vsel %vm896_vm3, 1.0, %v3042_v16 }
 0x1cb   : > { %v944_v8 = vadd.f32 %v1588_v14, %v832_v47 }
 0x1cd   : > { %v743_v40 = vpop.permute.xlu1 %742 }
 0x1ce   : > { %vm777_vm5 = vcmp.eq.s32.totalorder %v743_v40, %v2361_v2 }
 0x1cf   : > { %v1565_v4 = vsel %vm777_vm5, 1.0, %v3042_v16 }
 0x1d0   : > { %v825_v7 = vadd.f32 %v1565_v4, %v713_v18 }
 0x1d2   : > { %v961_v25 = vpop.permute.xlu1 %960 }
 0x1d3   : > { %vm999_vm0 = vcmp.eq.s32.totalorder %v961_v25, %v2361_v2 }
 0x1d4   : > { %v1595_v3 = vsel %vm999_vm0, 1.0, %v3042_v16 }
 0x1d5   : > { %v1047_v22 = vadd.f32 %v1595_v3, %v935_v57 }
 0x1d6   : > { %v985_v54 = vpop.permute.xlu1 %984 }
 0x1d7   : > { %vm1007_vm1 = vcmp.eq.s32.totalorder %v985_v54, %v2361_v2  ;;  %1683 = vmatprep.mubr.f32.mxu0 %v1047_v22 }
 0x1d8   : > { %v1603_v12 = vsel %vm1007_vm1, 1.0, %v3042_v16  ;;  %1684 = vmatmul.mubr.f32.gmra.mxu0 %v1048_v44 }
 0x1d9   : > { %v1055_v62 = vadd.f32 %v1603_v12, %v943_v32 }
 0x1db   : > { %v770_v27 = vpop.permute.xlu1 %769  ;;  %1695 = vmatprep.mubr.f32.mxu1 %v1055_v62 }
 0x1dc   : > { %vm786_vm10 = vcmp.eq.s32.totalorder %v770_v27, %v2361_v2 }
 0x1dd   : > { %v1574_v1 = vsel %vm786_vm10, 1.0, %v3042_v16 }
 0x1de   : > { %v834_v36 = vadd.f32 %v1574_v1, %v722_v34 }
 0x1e0   : > { %v988_v13 = vpop.permute.xlu1 %987 }
 0x1e1   : > { %vm1008_vm6 = vcmp.eq.s32.totalorder %v988_v13, %v2361_v2 }
 0x1e2   : > { %v1604_v58 = vsel %vm1008_vm6, 1.0, %v3042_v16 }
 0x1e3   : > { %v1056_v33 = vadd.f32 %v1604_v58, %v944_v8 }
 0x1e5   : > { %v855_v59 = vpop.permute.xlu1 %854  ;;  %1696 = vmatmul.mubr.f32.gmra.mxu1 %v1056_v33 }
 0x1e6   : > { %vm889_vm8 = vcmp.eq.s32.totalorder %v855_v59, %v2361_v2 }
 0x1e7   : > { %v1581_v39 = vsel %vm889_vm8, 1.0, %v3042_v16 }
 0x1e8   : > { %v937_v9 = vadd.f32 %v1581_v39, %v825_v7 }
 0x1e9   : > { %v858_v29 = vpop.permute.xlu1 %857 }
 0x1ea   : > { %v1049_v55 = vadd.f32 %v1597_v53, %v937_v9  ;;  %vm890_vm12 = vcmp.eq.s32.totalorder %v858_v29, %v2361_v2 }
 0x1eb   : > { %v1582_v26 = vsel %vm890_vm12, 1.0, %v3042_v16 }
 0x1ec   : > { %1686 = vmatprep.mubr.f32.mxu0 %v1049_v55  ;;  %v938_v43 = vadd.f32 %v1582_v26, %v2782_v11 }
 0x1ed   : > { %v882_v10 = vpop.permute.xlu1 %881 }
 0x1ee   : > { %vm898_vm11 = vcmp.eq.s32.totalorder %v882_v10, %v2361_v2 }
 0x1ef   : > { %v1590_v24 = vsel %vm898_vm11, 1.0, %v3042_v16 }
 0x1f0   : > { %v946_v50 = vadd.f32 %v1590_v24, %v834_v36 }
 0x1f2   : > { %v991_v56 = vpop.permute.xlu1 %990  ;;  %v1058_v35 = vadd.f32 %v1606_v28, %v946_v50 }
 0x1f3   : > { %vm1009_vm14 = vcmp.eq.s32.totalorder %v991_v56, %v2361_v2 }
 0x1f4   : > { %v1605_v20 = vsel %vm1009_vm14, 1.0, %v3042_v16 }
 0x1f5   : > { %v1057_v51 = vadd.f32 %v1605_v20, %v2596_v46 }
 0x1f6   : > { %v970_v0 = vpop.permute.xlu1 %969 }
 0x1f7   : > { %vm1002_vm15 = vcmp.eq.s32.totalorder %v970_v0, %v2361_v2  ;;  %1698 = vmatprep.mubr.f32.mxu1 %v1057_v51 }
 0x1f8   : > { %v1598_v17 = vsel %vm1002_vm15, 1.0, %v3042_v16  ;;  %1699 = vmatmul.mubr.f32.gmra.mxu1 %v1058_v35 }
 0x1f9   : > { %v1050_v21 = vadd.f32 %v1598_v17, %v938_v43 }
 0x1fb   : > { %1687 = vmatmul.mubr.f32.gmra.mxu0 %v1050_v21 }
 0x211   : > { %v1679_v48 = vpop.f32.mrf.mxu0 }
 0x212   : > { %1222 = vmax.xlane.f32.xlu0 %v1679_v48 }
 0x213   : > { %v1141_v63 = vpop.f32.mrf.mxu0 }
 0x214   : > { %1220 = vmax.xlane.f32.xlu1 %v1141_v63 }
 0x224   : > { %v1682_v23 = vpop.f32.mrf.mxu0 }
 0x225   : > { %1226 = vmax.xlane.f32.xlu1 %v1682_v23 }
 0x226   : > { %v1151_v31 = vpop.f32.mrf.mxu0 }
 0x227   : > { %1224 = vmax.xlane.f32.xlu0 %v1151_v31 }
 0x229   : > { %v1691_v11 = vpop.f32.mrf.mxu1 }
 0x22b   : > { %v1181_v16 = vpop.f32.mrf.mxu1 }
 0x275   : > { %v1694_v37 = vpop.f32.mrf.mxu1 }
 0x277   : > { %v1191_v60 = vpop.f32.mrf.mxu1 }
 0x298   : > { %v1685_v46 = vpop.f32.mrf.mxu0 }
 0x299   : > { %1230 = vmax.xlane.f32.xlu1 %v1685_v46 }
 0x29a   : > { %v1161_v40 = vpop.f32.mrf.mxu0 }
 0x29b   : > { %1228 = vmax.xlane.f32.xlu0 %v1161_v40  ;;  %v1223_v2 = vpop.xlane.xlu0 %1222 }
 0x29c   : > { %v2862_v19 = vsub.f32 %v1679_v48, %v1223_v2 }
 0x29d   : > { %v1221_v45 = vpop.xlane.xlu1 %1220 }
 0x29e   : > { %v2866_v15 = vsub.f32 %v1141_v63, %v1221_v45  ;;  %v1270_v38 = vmul.f32 1.442695, %v2862_v19 }
 0x2a0   : > { %v1268_v57 = vmul.f32 1.442695, %v2866_v15  ;;  %1837 = vpow2.f32 %v1270_v38 }
 0x2a2   : > { %1839 = vpow2.f32 %v1268_v57 }
 0x2a5   : > { %v1697_v3 = vpop.f32.mrf.mxu1 }
 0x2a7   : > { %v1201_v30 = vpop.f32.mrf.mxu1 }
 0x2ad   : > { %v1838_v54 = vpop.eup %1837 }
 0x2ae   : > { %v1227_v12 = vpop.xlane.xlu1 %1226 }
 0x2af   : > { %v1840_v32 = vpop.eup %1839  ;;  %v2877_v61 = vsub.f32 %v1682_v23, %v1227_v12 }
 0x2b0   : > { %v1225_v62 = vpop.xlane.xlu0 %1224 }
 0x2b1   : > { %v2881_v4 = vsub.f32 %v1151_v31, %v1225_v62  ;;  %v1274_v59 = vmul.f32 1.442695, %v2877_v61 }
 0x2b3   : > { %v1272_v53 = vmul.f32 1.442695, %v2881_v4 }
 0x2b8   : > { %v1700_v22 = vpop.f32.mrf.mxu1 }
 0x2ba   : > { %v2874_v44 = vpop.f32.mrf.mxu1 }
 0x2bb   : > { %v2864_v42 = vpop.f32.mrf.mxu0 }
 0x2bc   : > { %1234 = vmax.xlane.f32.xlu1 %v2864_v42 }
 0x2bd   : > { %v2869_v25 = vpop.f32.mrf.mxu0 }
 0x2be   : > { %1232 = vmax.xlane.f32.xlu0 %v2869_v25 }
 0x2c0   : > { %1238 = vmax.xlane.f32.xlu1 %v1691_v11 }
 0x2c2   : > { %1236 = vmax.xlane.f32.xlu0 %v1181_v16 }
 0x2c4   : > { %1242 = vmax.xlane.f32.xlu1 %v1694_v37 }
 0x2c6   : > { %1240 = vmax.xlane.f32.xlu0 %v1191_v60 }
 0x2c8   : > { %1246 = vmax.xlane.f32.xlu1 %v1697_v3 }
 0x2ca   : > { %1244 = vmax.xlane.f32.xlu0 %v1201_v30 }
 0x2cc   : > { %1250 = vmax.xlane.f32.xlu1 %v1700_v22 }
 0x2ce   : > { %1248 = vmax.xlane.f32.xlu0 %v2874_v44 }
 0x2d0   : > { %1302 = vadd.xlane.f32.xlu1 %v1838_v54 }
 0x2d2   : > { %1300 = vadd.xlane.f32.xlu0 %v1840_v32 }
 0x322   : > { %v1231_v27 = vpop.xlane.xlu1 %1230 }
 0x323   : > { %v2893_v5 = vsub.f32 %v1685_v46, %v1231_v27 }
 0x324   : > { %v1229_v52 = vpop.xlane.xlu0 %1228 }
 0x325   : > { %v2896_v49 = vsub.f32 %v1161_v40, %v1229_v52  ;;  %v1278_v24 = vmul.f32 1.442695, %v2893_v5 }
 0x327   : > { %v1276_v56 = vmul.f32 1.442695, %v2896_v49 }
 0x345   : > { %v1235_v14 = vpop.xlane.xlu1 %1234 }
 0x346   : > { %v2906_v28 = vsub.f32 %v2864_v42, %v1235_v14 }
 0x347   : > { %v1233_v47 = vpop.xlane.xlu0 %1232 }
 0x348   : > { %v2910_v43 = vsub.f32 %v2869_v25, %v1233_v47  ;;  %v1282_v48 = vmul.f32 1.442695, %v2906_v28 }
 0x349   : > { %v1239_v13 = vpop.xlane.xlu1 %1238 }
 0x34a   : > { %v2879_v8 = vsub.f32 %v1691_v11, %v1239_v13  ;;  %v1280_v31 = vmul.f32 1.442695, %v2910_v43 }
 0x34b   : > { %v1237_v58 = vpop.xlane.xlu0 %1236 }
 0x34c   : > { %v1286_v33 = vmul.f32 1.442695, %v2879_v8  ;;  %v2884_v18 = vsub.f32 %v1181_v16, %v1237_v58 }
 0x34d   : > { %v1243_v41 = vpop.xlane.xlu1 %1242 }
 0x34e   : > { %1841 = vpow2.f32 %v1286_v33  ;;  %v1284_v7 = vmul.f32 1.442695, %v2884_v18  ;;  %v2888_v39 = vsub.f32 %v1694_v37, %v1243_v41 }
 0x34f   : > { %v1241_v9 = vpop.xlane.xlu0 %1240 }
 0x350   : > { %1843 = vpow2.f32 %v1284_v7  ;;  %v2891_v29 = vsub.f32 %v1191_v60, %v1241_v9  ;;  %v1290_v1 = vmul.f32 1.442695, %v2888_v39 }
 0x351   : > { %v1247_v55 = vpop.xlane.xlu1 %1246  ;;  %1845 = vpow2.f32 %v1274_v59 }
 0x352   : > { %1847 = vpow2.f32 %v1272_v53  ;;  %v1288_v34 = vmul.f32 1.442695, %v2891_v29  ;;  %v2900_v36 = vsub.f32 %v1697_v3, %v1247_v55 }
 0x353   : > { %v1245_v10 = vpop.xlane.xlu0 %1244  ;;  %1849 = vpow2.f32 %v1290_v1 }
 0x354   : > { %1851 = vpow2.f32 %v1288_v34  ;;  %v2903_v26 = vsub.f32 %v1201_v30, %v1245_v10  ;;  %v1294_v51 = vmul.f32 1.442695, %v2900_v36 }
 0x355   : > { %v1251_v6 = vpop.xlane.xlu1 %1250  ;;  %1853 = vpow2.f32 %v1278_v24 }
 0x356   : > { %v1292_v17 = vmul.f32 1.442695, %v2903_v26  ;;  %v2914_v63 = vsub.f32 %v1700_v22, %v1251_v6 }
 0x357   : > { %v1249_v50 = vpop.xlane.xlu0 %1248 }
 0x358   : > { %v2918_v46 = vsub.f32 %v2874_v44, %v1249_v50  ;;  %v1298_v11 = vmul.f32 1.442695, %v2914_v63 }
 0x359   : > { %v1303_v20 = vpop.xlane.xlu1 %1302 }
 0x35a   : > { %1855 = vlog2.f32 %v1303_v20  ;;  %v1296_v45 = vmul.f32 1.442695, %v2918_v46 }
 0x35b   : > { %v1842_v0 = vpop.eup %1841  ;;  %v1301_v35 = vpop.xlane.xlu0 %1300  ;;  %1857 = vpow2.f32 %v1276_v56 }
 0x35c   : > { %1318 = vadd.xlane.f32.xlu1 %v1842_v0  ;;  %1859 = vlog2.f32 %v1301_v35 }
 0x35d   : > { %v1844_v21 = vpop.eup %1843  ;;  %1861 = vpow2.f32 %v1294_v51 }
 0x35e   : > { %1316 = vadd.xlane.f32.xlu0 %v1844_v21  ;;  %v1846_v23 = vpop.eup %1845  ;;  %1863 = vpow2.f32 %v1292_v17 }
 0x35f   : > { %v1848_v40 = vpop.eup %1847  ;;  %1865 = vpow2.f32 %v1282_v48 }
 0x360   : > { %1306 = vadd.xlane.f32.xlu1 %v1846_v23  ;;  %v1850_v2 = vpop.eup %1849  ;;  %1867 = vpow2.f32 %v1280_v31 }
 0x361   : > { %v1852_v16 = vpop.eup %1851  ;;  %1869 = vpow2.f32 %v1298_v11 }
 0x362   : > { %1304 = vadd.xlane.f32.xlu0 %v1848_v40  ;;  %v1854_v42 = vpop.eup %1853  ;;  %1871 = vpow2.f32 %v1296_v45 }
 0x364   : > { %1322 = vadd.xlane.f32.xlu1 %v1850_v2 }
 0x366   : > { %1320 = vadd.xlane.f32.xlu0 %v1852_v16 }
 0x367   : > { %v1856_v37 = vpop.eup %1855 }
 0x368   : > { %1310 = vadd.xlane.f32.xlu1 %v1854_v42  ;;  %v1858_v25 = vpop.eup %1857  ;;  %v1335_v38 = vmul.f32 0.6931472, %v1856_v37 }
 0x369   : > { %v1860_v57 = vpop.eup %1859 }
 0x36a   : > { %1308 = vadd.xlane.f32.xlu0 %v1858_v25  ;;  %v1862_v60 = vpop.eup %1861  ;;  %v1365_v3 = vsub.f32 %v2862_v19, %v1335_v38  ;;  %v1333_v30 = vmul.f32 0.6931472, %v1860_v57 }
 0x36b   : > { %v1864_v22 = vpop.eup %1863 }
 0x36c   : > { %1326 = vadd.xlane.f32.xlu1 %v1862_v60  ;;  %1381 = vst [vmem:[%s2926_s22 + $0x8] sm:$0xff] %v1365_v3  ;;  %v1364_v44 = vsub.f32 %v2866_v15, %v1333_v30  ;;  %v1866_v54 = vpop.eup %1865 }
 0x36d   : > { %v1868_v32 = vpop.eup %1867 }
 0x36e   : > { %1324 = vadd.xlane.f32.xlu0 %v1864_v22  ;;  %1380 = vst [vmem:[%s2926_s22] sm:$0xff] %v1364_v44  ;;  %v1870_v12 = vpop.eup %1869 }
 0x36f   : > { %v1872_v62 = vpop.eup %1871 }
 0x370   : > { %1314 = vadd.xlane.f32.xlu1 %v1866_v54 }
 0x372   : > { %1312 = vadd.xlane.f32.xlu0 %v1868_v32 }
 0x374   : > { %1330 = vadd.xlane.f32.xlu1 %v1870_v12 }
 0x376   : > { %1328 = vadd.xlane.f32.xlu0 %v1872_v62 }
 0x3e5   : > { %v1319_v19 = vpop.xlane.xlu1 %1318 }
 0x3e6   : > { %1873 = vlog2.f32 %v1319_v19 }
 0x3e7   : > { %v1317_v27 = vpop.xlane.xlu0 %1316 }
 0x3e8   : > { %1875 = vlog2.f32 %v1317_v27 }
 0x3e9   : > { %v1307_v52 = vpop.xlane.xlu1 %1306 }
 0x3ea   : > { %1877 = vlog2.f32 %v1307_v52 }
 0x3eb   : > { %v1305_v14 = vpop.xlane.xlu0 %1304 }
 0x3ec   : > { %1879 = vlog2.f32 %v1305_v14 }
 0x3ed   : > { %v1323_v47 = vpop.xlane.xlu1 %1322 }
 0x3ee   : > { %1881 = vlog2.f32 %v1323_v47 }
 0x3ef   : > { %v1321_v15 = vpop.xlane.xlu0 %1320 }
 0x3f0   : > { %1883 = vlog2.f32 %v1321_v15 }
 0x3f1   : > { %v1311_v13 = vpop.xlane.xlu1 %1310 }
 0x3f2   : > { %1885 = vlog2.f32 %v1311_v13 }
 0x3f3   : > { %v1874_v58 = vpop.eup %1873  ;;  %v1309_v33 = vpop.xlane.xlu0 %1308 }
 0x3f4   : > { %v1351_v41 = vmul.f32 0.6931472, %v1874_v58  ;;  %1887 = vlog2.f32 %v1309_v33 }
 0x3f5   : > { %v1876_v59 = vpop.eup %1875  ;;  %v1327_v7 = vpop.xlane.xlu1 %1326 }
 0x3f6   : > { %v1373_v9 = vsub.f32 %v2879_v8, %v1351_v41  ;;  %v1349_v53 = vmul.f32 0.6931472, %v1876_v59  ;;  %1889 = vlog2.f32 %v1327_v7 }
 0x3f7   : > { %v1878_v55 = vpop.eup %1877  ;;  %v1325_v1 = vpop.xlane.xlu0 %1324 }
 0x3f8   : > { %1389 = vst [vmem:[%s2926_s22 + $0x48] sm:$0xff] %v1373_v9  ;;  %v1372_v10 = vsub.f32 %v2884_v18, %v1349_v53  ;;  %v1339_v34 = vmul.f32 0.6931472, %v1878_v55  ;;  %1891 = vlog2.f32 %v1325_v1 }
 0x3f9   : > { %v1880_v6 = vpop.eup %1879  ;;  %v1315_v24 = vpop.xlane.xlu1 %1314 }
 0x3fa   : > { %1388 = vst [vmem:[%s2926_s22 + $0x40] sm:$0xff] %v1372_v10  ;;  %v1367_v50 = vsub.f32 %v2877_v61, %v1339_v34  ;;  %v1337_v56 = vmul.f32 0.6931472, %v1880_v6  ;;  %1893 = vlog2.f32 %v1315_v24 }
 0x3fb   : > { %v1882_v8 = vpop.eup %1881  ;;  %v1313_v20 = vpop.xlane.xlu0 %1312 }
 0x3fc   : > { %1383 = vst [vmem:[%s2926_s22 + $0x18] sm:$0xff] %v1367_v50  ;;  %v1366_v51 = vsub.f32 %v2881_v4, %v1337_v56  ;;  %v1355_v0 = vmul.f32 0.6931472, %v1882_v8  ;;  %1895 = vlog2.f32 %v1313_v20 }
 0x3fd   : > { %v1884_v18 = vpop.eup %1883  ;;  %v1331_v35 = vpop.xlane.xlu1 %1330 }
 0x3fe   : > { %1382 = vst [vmem:[%s2926_s22 + $0x10] sm:$0xff] %v1366_v51  ;;  %v1375_v17 = vsub.f32 %v2888_v39, %v1355_v0  ;;  %v1353_v21 = vmul.f32 0.6931472, %v1884_v18  ;;  %1897 = vlog2.f32 %v1331_v35 }
 0x3ff   : > { %v1886_v61 = vpop.eup %1885  ;;  %v1329_v48 = vpop.xlane.xlu0 %1328 }
 0x400   : > { %1391 = vst [vmem:[%s2926_s22 + $0x58] sm:$0xff] %v1375_v17  ;;  %v1374_v23 = vsub.f32 %v2891_v29, %v1353_v21  ;;  %v1343_v31 = vmul.f32 0.6931472, %v1886_v61  ;;  %1899 = vlog2.f32 %v1329_v48 }
 0x401   : > { %v1888_v4 = vpop.eup %1887 }
 0x402   : > { %1390 = vst [vmem:[%s2926_s22 + $0x50] sm:$0xff] %v1374_v23  ;;  %v1369_v40 = vsub.f32 %v2893_v5, %v1343_v31  ;;  %v1341_v11 = vmul.f32 0.6931472, %v1888_v4 }
 0x403   : > { %v1890_v2 = vpop.eup %1889 }
 0x404   : > { %1385 = vst [vmem:[%s2926_s22 + $0x28] sm:$0xff] %v1369_v40  ;;  %v1368_v39 = vsub.f32 %v2896_v49, %v1341_v11  ;;  %v1359_v45 = vmul.f32 0.6931472, %v1890_v2 }
 0x405   : > { %v1892_v16 = vpop.eup %1891 }
 0x406   : > { %1384 = vst [vmem:[%s2926_s22 + $0x20] sm:$0xff] %v1368_v39  ;;  %v1377_v29 = vsub.f32 %v2900_v36, %v1359_v45  ;;  %v1357_v42 = vmul.f32 0.6931472, %v1892_v16 }
 0x407   : > { %v1894_v37 = vpop.eup %1893 }
 0x408   : > { %1393 = vst [vmem:[%s2926_s22 + $0x68] sm:$0xff] %v1377_v29  ;;  %v1376_v25 = vsub.f32 %v2903_v26, %v1357_v42  ;;  %v1347_v5 = vmul.f32 0.6931472, %v1894_v37 }
 0x409   : > { %v1896_v38 = vpop.eup %1895 }
 0x40a   : > { %1392 = vst [vmem:[%s2926_s22 + $0x60] sm:$0xff] %v1376_v25  ;;  %v1371_v57 = vsub.f32 %v2906_v28, %v1347_v5  ;;  %v1345_v49 = vmul.f32 0.6931472, %v1896_v38 }
 0x40b   : > { %v1898_v60 = vpop.eup %1897 }
 0x40c   : > { %1387 = vst [vmem:[%s2926_s22 + $0x38] sm:$0xff] %v1371_v57  ;;  %v1370_v3 = vsub.f32 %v2910_v43, %v1345_v49  ;;  %v1363_v36 = vmul.f32 0.6931472, %v1898_v60 }
 0x40d   : > { %v1900_v30 = vpop.eup %1899 }
 0x40e   : > { %1386 = vst [vmem:[%s2926_s22 + $0x30] sm:$0xff] %v1370_v3  ;;  %v1379_v26 = vsub.f32 %v2914_v63, %v1363_v36  ;;  %v1361_v22 = vmul.f32 0.6931472, %v1900_v30 }
 0x410   : > { %1395 = vst [vmem:[%s2926_s22 + $0x78] sm:$0xff] %v1379_v26  ;;  %v1378_v28 = vsub.f32 %v2918_v46, %v1361_v22 }
 0x412   : > { %1394 = vst [vmem:[%s2926_s22 + $0x70] sm:$0xff] %v1378_v28 }
 0x413   : > { %1921 = shalt.err (!%p1918_p3)
}
 0x414   : > { %s1922_s5 = scalar_lea.hbm %s2961_s28, 2048  ;;  %s1926_s8 = scalar_lea.hbm %s3012_s2, 4096 }
 0x415   : > { %p1923_p4 = scmp.ne.s32.totalorder %s2961_s28, %s1922_s5  ;;  %p1927_p9 = scmp.lt.s32.totalorder %s2961_s28, %s3012_s2 }
 0x416   : > { %p1928_p10 = scmp.lt.s32.totalorder %s1926_s8, %s1922_s5 }
 0x417   : > { %p1924_p7 = pnand %p1923_p4, %p2035_p5 }
 0x418   : > { %p1929_p11 = por %p1928_p10, %p1927_p9 }
 0x419   : > { %p1925_p8 = pneg %p1924_p7 }
 0x41b   : > { %p1930_p12 = pnand %p1929_p11, %p1925_p8 }
 0x41d   : > { %1933 = shalt.err (!%p1930_p12)
}
 0x41e   : > { %s1980_s17 = smov 128   ;;  %s1981_s25 = smov 8  }
 0x41f   : > { %1733 = dma.vmem_to_hbm [thread:$0]  (%p2035_p5), %s2963_s24, 2048, %s2961_s28, %s2970_s13, %s1980_s17, %s1980_s17, %s1981_s25  }
 0x420 PF: > { %p1739_p13 = scmp.ge.s32.totalorder %s1968_s12, 2  ;;  %s1425_s21 = sand.u32 1, %s1956_s9  }
 0x421   : > { %s1426_s22 = scalar_lea.sflag [#allocation3], %s1425_s21 }
 0x422   : > { %p1736_p0 = pnand %p1739_p13, %p2039_p6 }
 0x424   : > { %p1737_p1 = pneg %p1736_p0 }
 0x426   : > { %1951 = dma.done.wait (%p1737_p1), %s1426_s22, 2048  }
 0x427   : > { %1953 = vsyncadd (%p1737_p1), %s1426_s22, 4294965248  ;;  %p12_p2 = scmp.ge.s32.totalorder %s2022_s15, 4   ;;  %s3055_s9 = smov %s1960_s10 }
 0x428   : > { %s3056_s10 = smov %s1964_s11  ;;  %s3057_s11 = smov %s2033_s18 }
 0x429   : > { %s3058_s12 = smov %s2022_s15  ;;  %14 = sbr.rel (!%p12_p2) target bundleno = 3 (0x3), region = 63 }
 0x42e   :  { %1431 = vsyncpa [#allocation3], 1 }
 0x42f   :  { %1433 = vsyncpa [#allocation3 + $0x1], 1 }

</bundles_post_ra>
